<compile_context>
chip_gen: v7x
topology: tpu7x:2x2x1
jax: 0.10.0
libtpu: 0.0.40
codegen_flags: <defaults>
</compile_context>

<pallas_src>
import functools

import jax
import jax.numpy as jnp
from jax import lax
from jax.experimental import pallas as pl
from jax.experimental.pallas import tpu as pltpu


def _round_up(n, m):
    return (n + m - 1) // m * m


def _pick_time_chunk(S, target=128):
    """Largest chunk <= target that divides S and satisfies the (8,128) block rule."""
    if S <= target:
        return S
    for ts in range(target, 7, -1):
        if S % ts == 0 and ts % 8 == 0:
            return ts
    return S  # no suitable divisor: keep the whole sequence resident


def lstm_kernel(x_ref, wx_ref, wh_ref, b_ref, wp_ref, bp_ref, out_ref,
                xb_ref, h_ref, c_ref):
    """One time chunk of the fused-gate LSTM recurrence (batch-major layout).

    x_ref : (T, B, 1)       time-major scalar inputs for this chunk (input_dim == 1)
    wx_ref: (1, 4H)   f32   fused input weights, gate order [g | i | f | o]
    wh_ref: (H, 4H)   bf16  fused recurrent weights (pre-transposed: h @ wh -> (B, 4H))
    b_ref : (1, 4H)   f32   fused gate biases
    wp_ref: (H, C)    bf16  output projection (pre-transposed)
    bp_ref: (1, C)    f32   output bias (pre-transposed)
    out_ref: (B, C)         classifier output (written on the last chunk only)
    xb_ref: (T, B, 4H) f32  scratch: hoisted input-side contribution x*wx + b
    h_ref, c_ref: (B, H) f32 state, carried in VMEM across grid steps
    """
    t = pl.program_id(0)
    T = x_ref.shape[0]
    H = wh_ref.shape[0]            # padded hidden size (multiple of 128)

    @pl.when(t == 0)
    def _():
        h_ref[...] = jnp.zeros_like(h_ref)
        c_ref[...] = jnp.zeros_like(c_ref)

    # Hoist the (rank-1, input_dim == 1) input contribution off the serial chain:
    # one full-occupancy VPU pass per chunk instead of a broadcast-mul per step.
    # (T,B,1) * (1,1,4H) + (1,1,4H) -> (T,B,4H); only unit-dim broadcasts involved.
    xb_ref[...] = (x_ref[...] * wx_ref[...][None, :, :]
                   + b_ref[...][None, :, :])

    wh = wh_ref[...]               # (H, 4H) bf16, resident for the whole chunk

    def step(j, carry):
        h, c = carry
        # Single bf16 MXU matmul per step (f32 accumulation); rest is VPU/EUP.
        pre = xb_ref[j] + jnp.dot(h.astype(jnp.bfloat16), wh,
                                  preferred_element_type=jnp.float32)   # (B, 4H)
        g = jnp.tanh(pre[:, :H])                    # lane-aligned: H % 128 == 0
        ifo = jax.nn.sigmoid(pre[:, H:])            # (B, 3H), one batched EUP pass
        i = ifo[:, :H]
        f = ifo[:, H:2 * H]
        o = ifo[:, 2 * H:]
        c = g * i + c * f
        h = jnp.tanh(c) * o
        return h, c

    # Fully unroll short chunks; unroll=8 gives the scheduler overlap window on long ones.
    h, c = lax.fori_loop(0, T, step, (h_ref[...], c_ref[...]),
                         unroll=True if T <= 16 else 8)
    h_ref[...] = h
    c_ref[...] = c

    @pl.when(t == pl.num_programs(0) - 1)
    def _():
        p = jnp.dot(h.astype(jnp.bfloat16), wp_ref[...],
                    preferred_element_type=jnp.float32) + bp_ref[...]
        out_ref[...] = p.astype(out_ref.dtype)      # lane-dense store (C % 128 == 0)


def pack_params(params):
    """Fuse / pad / pre-transpose the gate parameters ONCE (outside the jit path).

    Padding H and C up to multiples of 128 is exact: padded gate columns have zero
    weights and biases, so g_pad = 0, i/f/o_pad = 0.5, and the padded cell/hidden
    state stays identically zero through the recurrence.
    """
    H, input_dim = params["W_gx"].shape
    assert input_dim == 1, "kernel exploits input_dim == 1 (rank-1 input contribution)"
    C = params["W_ph"].shape[0]
    Hp = _round_up(H, 128)
    Cp = _round_up(C, 128)

    def pad(a, shape):
        out = jnp.zeros(shape, jnp.float32)
        return out.at[:a.shape[0], :a.shape[1]].set(a.astype(jnp.float32))

    gates = ("g", "i", "f", "o")
    wx = jnp.concatenate([pad(params[f"W_{k}x"], (Hp, 1)) for k in gates], axis=0).T    # (1, 4Hp)
    wh = jnp.concatenate([pad(params[f"W_{k}h"].T, (Hp, Hp)) for k in gates], axis=1)   # (Hp, 4Hp)
    b = jnp.concatenate([pad(params[f"bias_{k}"], (Hp, 1)) for k in gates], axis=0).T   # (1, 4Hp)
    wp = pad(params["W_ph"].T, (Hp, Cp))                                                # (Hp, Cp)
    bp = pad(params["bias_p"], (Cp, 1)).T                                               # (1, Cp)
    return {
        "wx": wx,
        "wh": wh.astype(jnp.bfloat16),   # MXU-native operand dtype
        "b": b,
        "wp": wp.astype(jnp.bfloat16),
        "bp": bp,
    }


@functools.partial(jax.jit, static_argnames=("num_classes", "time_chunk"))
def lstm_forward(x, wx, wh, b, wp, bp, *, num_classes, time_chunk=128):
    """x: (batch, seq_length) f32. Returns (batch, num_classes) f32."""
    B, S = x.shape
    Hp, G = wh.shape                       # padded hidden, 4*padded hidden
    Cp = wp.shape[1]                       # padded classes
    Bp = _round_up(max(B, 8), 8)           # fill the f32 sublane axis; B=2 is a worst case
    T = _pick_time_chunk(S, time_chunk)

    # Time-major, batch-padded input. Compact in HBM; only the in-flight chunk
    # pays VMEM tile padding (bounded by the time-chunked grid below).
    x_tm = jnp.zeros((S, Bp, 1), jnp.float32).at[:, :B, 0].set(x.T)

    out_pad = pl.pallas_call(
        lstm_kernel,
        out_shape=jax.ShapeDtypeStruct((Bp, Cp), jnp.float32),
        grid=(S // T,),
        in_specs=[
            pl.BlockSpec((T, Bp, 1), lambda t: (t, 0, 0)),   # streamed + double-buffered
            pl.BlockSpec((1, G), lambda t: (0, 0)),          # weights: constant index ->
            pl.BlockSpec((Hp, G), lambda t: (0, 0)),         #   resident across the grid
            pl.BlockSpec((1, G), lambda t: (0, 0)),
            pl.BlockSpec((Hp, Cp), lambda t: (0, 0)),
            pl.BlockSpec((1, Cp), lambda t: (0, 0)),
        ],
        out_specs=pl.BlockSpec((Bp, Cp), lambda t: (0, 0)),  # resident; written at last chunk
        scratch_shapes=[
            pltpu.VMEM((T, Bp, G), jnp.float32),             # hoisted x*wx + b
            pltpu.VMEM((Bp, Hp), jnp.float32),               # h carry
            pltpu.VMEM((Bp, Hp), jnp.float32),               # c carry
        ],
        compiler_params=pltpu.CompilerParams(
            dimension_semantics=("arbitrary",),              # sequential recurrence
        ),
    )(x_tm, wx, wh, b, wp, bp)
    # TODO(synk): for B >= 16 on v7x, add a leading 'parallel' batch grid axis so the
    #             second TensorCore runs half the batch; for very large H, stream wh
    #             over the 4H axis with pltpu.emit_pipeline and set vmem_limit_bytes.
    return out_pad[:B, :num_classes]


def init_params(key, input_dim, num_hidden, num_classes, std=0.001):
    ks = jax.random.split(key, 7)
    n = lambda k, shape: (std * jax.random.normal(k, shape)).astype(jnp.float32)
    z = lambda shape: jnp.zeros(shape, jnp.float32)
    return {
        "W_gx": n(ks[0], (num_hidden, input_dim)), "W_gh": n(ks[1], (num_hidden, num_hidden)),
        "bias_g": z((num_hidden, 1)),
        "W_ix": n(ks[2], (num_hidden, input_dim)), "W_ih": n(ks[3], (num_hidden, num_hidden)),
        "bias_i": z((num_hidden, 1)),
        "W_fx": n(ks[4], (num_hidden, input_dim)), "W_fh": n(ks[5], (num_hidden, num_hidden)),
        "bias_f": z((num_hidden, 1)),
        "W_ox": n(ks[6], (num_hidden, input_dim)),
        "W_oh": n(jax.random.fold_in(key, 100), (num_hidden, num_hidden)),
        "bias_o": z((num_hidden, 1)),
        "W_ph": n(jax.random.fold_in(key, 200), (num_classes, num_hidden)),
        "bias_p": z((num_classes, 1)),
    }


def lstm_reference(x, params):
    """Pure-JAX f32 reference mirroring the PyTorch forward, for a sanity check."""
    B, S = x.shape
    H = params["W_gh"].shape[0]
    h = jnp.zeros((H, B), jnp.float32)
    c = jnp.zeros((H, B), jnp.float32)
    for j in range(S):
        x_t = x[:, j].reshape(1, -1)
        g = jnp.tanh(params["W_gx"] @ x_t + params["W_gh"] @ h + params["bias_g"])
        i = jax.nn.sigmoid(params["W_ix"] @ x_t + params["W_ih"] @ h + params["bias_i"])
        f = jax.nn.sigmoid(params["W_fx"] @ x_t + params["W_fh"] @ h + params["bias_f"])
        o = jax.nn.sigmoid(params["W_ox"] @ x_t + params["W_oh"] @ h + params["bias_o"])
        c = g * i + c * f
        h = jnp.tanh(c) * o
    p = params["W_ph"] @ h + params["bias_p"]
    return p.T


if __name__ == "__main__":
    seq_length, input_dim, num_hidden, num_classes, batch_size = 8, 1, 32, 10, 2

    key = jax.random.PRNGKey(0)
    pkey, xkey = jax.random.split(key)
    params = init_params(pkey, input_dim, num_hidden, num_classes)
    x = jax.random.normal(xkey, (batch_size, seq_length), dtype=jnp.float32)

    packed = pack_params(params)   # fuse / pad / transpose once, outside the call path
    out = lstm_forward(x, packed["wx"], packed["wh"], packed["b"],
                       packed["wp"], packed["bp"], num_classes=num_classes)
    out = jax.block_until_ready(out)
    ref = jax.block_until_ready(lstm_reference(x, params))

    assert out.shape == (batch_size, num_classes)
    # bf16 MXU operands (f32 accumulation) -> compare at bf16-appropriate tolerance.
    assert jnp.allclose(out, ref, atol=1e-4, rtol=1e-2), float(jnp.max(jnp.abs(out - ref)))
    print("KERNEL_OK")
</pallas_src>

<mosaic_0001>
module attributes {stable_mosaic.version = 11 : i64} {
  func.func @lstm_kernel(%arg0: i32, %arg1: memref<8x8x1xf32, #tpu.memory_space<vmem>>, %arg2: memref<1x512xf32, #tpu.memory_space<vmem>>, %arg3: memref<128x512xbf16, #tpu.memory_space<vmem>>, %arg4: memref<1x512xf32, #tpu.memory_space<vmem>>, %arg5: memref<128x128xbf16, #tpu.memory_space<vmem>>, %arg6: memref<1x128xf32, #tpu.memory_space<vmem>>, %arg7: memref<8x128xf32, #tpu.memory_space<vmem>>, %arg8: memref<8x8x512xf32, #tpu.memory_space<vmem>>, %arg9: memref<8x128xf32, #tpu.memory_space<vmem>>, %arg10: memref<8x128xf32, #tpu.memory_space<vmem>>) attributes {dimension_semantics = [#tpu.dimension_semantics<arbitrary>], iteration_bounds = array<i64: 1>, scalar_prefetch = 0 : i64, scratch_operands = 3 : i64, tpu.core_type = #tpu.core_type<tc>, window_params = [{transform_indices = @transform_0, window_bounds = array<i64: 8, 8, 1>}, {pipeline_mode = #tpu.pipeline_mode<synchronous>, transform_indices = @transform_1, window_bounds = array<i64: 1, 512>}, {pipeline_mode = #tpu.pipeline_mode<synchronous>, transform_indices = @transform_2, window_bounds = array<i64: 128, 512>}, {pipeline_mode = #tpu.pipeline_mode<synchronous>, transform_indices = @transform_3, window_bounds = array<i64: 1, 512>}, {pipeline_mode = #tpu.pipeline_mode<synchronous>, transform_indices = @transform_4, window_bounds = array<i64: 128, 128>}, {pipeline_mode = #tpu.pipeline_mode<synchronous>, transform_indices = @transform_5, window_bounds = array<i64: 1, 128>}, {pipeline_mode = #tpu.pipeline_mode<synchronous>, transform_indices = @transform_6, window_bounds = array<i64: 8, 128>}]} {
    %c0_i32 = arith.constant 0 : i32
    %0 = arith.cmpi eq, %arg0, %c0_i32 : i32
    %1 = arith.extui %0 : i1 to i32
    %c0_i32_0 = arith.constant 0 : i32
    %2 = arith.cmpi ne, %1, %c0_i32_0 : i32
    scf.if %2 {
      %cst_54 = arith.constant 0.000000e+00 : f32
      %198 = vector.broadcast %cst_54 : f32 to vector<8x128xf32>
      %c0_55 = arith.constant 0 : index
      %c0_56 = arith.constant 0 : index
      %199 = vector.load %arg9[%c0_55, %c0_56] : memref<8x128xf32, #tpu.memory_space<vmem>>, vector<8x128xf32>
      tpu.vector_store %arg9[%c0_55, %c0_56], %198 {strides = array<i32>} : memref<8x128xf32, #tpu.memory_space<vmem>>, vector<8x128xf32>,
      %cst_57 = arith.constant 0.000000e+00 : f32
      %200 = vector.broadcast %cst_57 : f32 to vector<8x128xf32>
      %c0_58 = arith.constant 0 : index
      %c0_59 = arith.constant 0 : index
      %201 = vector.load %arg10[%c0_58, %c0_59] : memref<8x128xf32, #tpu.memory_space<vmem>>, vector<8x128xf32>
      tpu.vector_store %arg10[%c0_58, %c0_59], %200 {strides = array<i32>} : memref<8x128xf32, #tpu.memory_space<vmem>>, vector<8x128xf32>,
    } else {
    }
    %c0 = arith.constant 0 : index
    %c0_1 = arith.constant 0 : index
    %c0_2 = arith.constant 0 : index
    %3 = vector.load %arg1[%c0, %c0_1, %c0_2] : memref<8x8x1xf32, #tpu.memory_space<vmem>>, vector<8x8x1xf32>
    %c0_3 = arith.constant 0 : index
    %c0_4 = arith.constant 0 : index
    %4 = vector.load %arg2[%c0_3, %c0_4] : memref<1x512xf32, #tpu.memory_space<vmem>>, vector<1x512xf32>
    %5 = vector.shape_cast %4 : vector<1x512xf32> to vector<1x1x512xf32>
    %6 = vector.broadcast %3 : vector<8x8x1xf32> to vector<8x8x512xf32>
    %7 = vector.broadcast %5 : vector<1x1x512xf32> to vector<8x8x512xf32>
    %8 = arith.mulf %6, %7 : vector<8x8x512xf32>
    %c0_5 = arith.constant 0 : index
    %c0_6 = arith.constant 0 : index
    %9 = vector.load %arg4[%c0_5, %c0_6] : memref<1x512xf32, #tpu.memory_space<vmem>>, vector<1x512xf32>
    %10 = vector.shape_cast %9 : vector<1x512xf32> to vector<1x1x512xf32>
    %11 = vector.broadcast %10 : vector<1x1x512xf32> to vector<8x8x512xf32>
    %12 = arith.addf %8, %11 : vector<8x8x512xf32>
    %c0_7 = arith.constant 0 : index
    %c0_8 = arith.constant 0 : index
    %c0_9 = arith.constant 0 : index
    %13 = vector.load %arg8[%c0_7, %c0_8, %c0_9] : memref<8x8x512xf32, #tpu.memory_space<vmem>>, vector<8x8x512xf32>
    tpu.vector_store %arg8[%c0_7, %c0_8, %c0_9], %12 {strides = array<i32>} : memref<8x8x512xf32, #tpu.memory_space<vmem>>, vector<8x8x512xf32>,
    %c0_10 = arith.constant 0 : index
    %c0_11 = arith.constant 0 : index
    %14 = vector.load %arg3[%c0_10, %c0_11] : memref<128x512xbf16, #tpu.memory_space<vmem>>, vector<128x512xbf16>
    %c0_12 = arith.constant 0 : index
    %c0_13 = arith.constant 0 : index
    %15 = vector.load %arg9[%c0_12, %c0_13] : memref<8x128xf32, #tpu.memory_space<vmem>>, vector<8x128xf32>
    %c0_14 = arith.constant 0 : index
    %c0_15 = arith.constant 0 : index
    %16 = vector.load %arg10[%c0_14, %c0_15] : memref<8x128xf32, #tpu.memory_space<vmem>>, vector<8x128xf32>
    %c0_i32_16 = arith.constant 0 : i32
    %17 = arith.index_cast %c0_i32_16 : i32 to index
    %c0_17 = arith.constant 0 : index
    %c0_18 = arith.constant 0 : index
    %18 = vector.load %arg8[%17, %c0_17, %c0_18] : memref<8x8x512xf32, #tpu.memory_space<vmem>>, vector<1x8x512xf32>
    %19 = vector.shape_cast %18 : vector<1x8x512xf32> to vector<8x512xf32>
    %20 = arith.truncf %15 : vector<8x128xf32> to vector<8x128xbf16>
    %cst = arith.constant dense<0.000000e+00> : vector<8x512xf32>
    %21 = tpu.matmul %20, %14, %cst {dimension_numbers = #tpu.dot_dimension_numbers<[1], [0], [0], [1], [0, 0, 1, 1], [], []>} : vector<8x128xbf16>, vector<128x512xbf16>, vector<8x512xf32> -> vector<8x512xf32>
    %22 = arith.addf %19, %21 : vector<8x512xf32>
    %23 = vector.extract_strided_slice %22 {offsets = [0, 0], sizes = [8, 128], strides = [1, 1]} : vector<8x512xf32> to vector<8x128xf32>
    %24 = math.tanh %23 : vector<8x128xf32>
    %25 = vector.extract_strided_slice %22 {offsets = [0, 128], sizes = [8, 384], strides = [1, 1]} : vector<8x512xf32> to vector<8x384xf32>
    %26 = arith.negf %25 : vector<8x384xf32>
    %27 = math.exp %26 : vector<8x384xf32>
    %cst_19 = arith.constant 1.000000e+00 : f32
    %28 = vector.broadcast %cst_19 : f32 to vector<8x384xf32>
    %29 = arith.addf %28, %27 : vector<8x384xf32>
    %30 = arith.divf %28, %29 : vector<8x384xf32>
    %31 = vector.extract_strided_slice %30 {offsets = [0, 0], sizes = [8, 128], strides = [1, 1]} : vector<8x384xf32> to vector<8x128xf32>
    %32 = vector.extract_strided_slice %30 {offsets = [0, 128], sizes = [8, 128], strides = [1, 1]} : vector<8x384xf32> to vector<8x128xf32>
    %33 = vector.extract_strided_slice %30 {offsets = [0, 256], sizes = [8, 128], strides = [1, 1]} : vector<8x384xf32> to vector<8x128xf32>
    %34 = arith.mulf %24, %31 : vector<8x128xf32>
    %35 = arith.mulf %16, %32 : vector<8x128xf32>
    %36 = arith.addf %34, %35 : vector<8x128xf32>
    %37 = math.tanh %36 : vector<8x128xf32>
    %38 = arith.mulf %37, %33 : vector<8x128xf32>
    %c1_i32 = arith.constant 1 : i32
    %39 = arith.index_cast %c1_i32 : i32 to index
    %c0_20 = arith.constant 0 : index
    %c0_21 = arith.constant 0 : index
    %40 = vector.load %arg8[%39, %c0_20, %c0_21] : memref<8x8x512xf32, #tpu.memory_space<vmem>>, vector<1x8x512xf32>
    %41 = vector.shape_cast %40 : vector<1x8x512xf32> to vector<8x512xf32>
    %42 = arith.truncf %38 : vector<8x128xf32> to vector<8x128xbf16>
    %cst_22 = arith.constant dense<0.000000e+00> : vector<8x512xf32>
    %43 = tpu.matmul %42, %14, %cst_22 {dimension_numbers = #tpu.dot_dimension_numbers<[1], [0], [0], [1], [0, 0, 1, 1], [], []>} : vector<8x128xbf16>, vector<128x512xbf16>, vector<8x512xf32> -> vector<8x512xf32>
    %44 = arith.addf %41, %43 : vector<8x512xf32>
    %45 = vector.extract_strided_slice %44 {offsets = [0, 0], sizes = [8, 128], strides = [1, 1]} : vector<8x512xf32> to vector<8x128xf32>
    %46 = math.tanh %45 : vector<8x128xf32>
    %47 = vector.extract_strided_slice %44 {offsets = [0, 128], sizes = [8, 384], strides = [1, 1]} : vector<8x512xf32> to vector<8x384xf32>
    %48 = arith.negf %47 : vector<8x384xf32>
    %49 = math.exp %48 : vector<8x384xf32>
    %cst_23 = arith.constant 1.000000e+00 : f32
    %50 = vector.broadcast %cst_23 : f32 to vector<8x384xf32>
    %51 = arith.addf %50, %49 : vector<8x384xf32>
    %52 = arith.divf %50, %51 : vector<8x384xf32>
    %53 = vector.extract_strided_slice %52 {offsets = [0, 0], sizes = [8, 128], strides = [1, 1]} : vector<8x384xf32> to vector<8x128xf32>
    %54 = vector.extract_strided_slice %52 {offsets = [0, 128], sizes = [8, 128], strides = [1, 1]} : vector<8x384xf32> to vector<8x128xf32>
    %55 = vector.extract_strided_slice %52 {offsets = [0, 256], sizes = [8, 128], strides = [1, 1]} : vector<8x384xf32> to vector<8x128xf32>
    %56 = arith.mulf %46, %53 : vector<8x128xf32>
    %57 = arith.mulf %36, %54 : vector<8x128xf32>
    %58 = arith.addf %56, %57 : vector<8x128xf32>
    %59 = math.tanh %58 : vector<8x128xf32>
    %60 = arith.mulf %59, %55 : vector<8x128xf32>
    %c2_i32 = arith.constant 2 : i32
    %61 = arith.index_cast %c2_i32 : i32 to index
    %c0_24 = arith.constant 0 : index
    %c0_25 = arith.constant 0 : index
    %62 = vector.load %arg8[%61, %c0_24, %c0_25] : memref<8x8x512xf32, #tpu.memory_space<vmem>>, vector<1x8x512xf32>
    %63 = vector.shape_cast %62 : vector<1x8x512xf32> to vector<8x512xf32>
    %64 = arith.truncf %60 : vector<8x128xf32> to vector<8x128xbf16>
    %cst_26 = arith.constant dense<0.000000e+00> : vector<8x512xf32>
    %65 = tpu.matmul %64, %14, %cst_26 {dimension_numbers = #tpu.dot_dimension_numbers<[1], [0], [0], [1], [0, 0, 1, 1], [], []>} : vector<8x128xbf16>, vector<128x512xbf16>, vector<8x512xf32> -> vector<8x512xf32>
    %66 = arith.addf %63, %65 : vector<8x512xf32>
    %67 = vector.extract_strided_slice %66 {offsets = [0, 0], sizes = [8, 128], strides = [1, 1]} : vector<8x512xf32> to vector<8x128xf32>
    %68 = math.tanh %67 : vector<8x128xf32>
    %69 = vector.extract_strided_slice %66 {offsets = [0, 128], sizes = [8, 384], strides = [1, 1]} : vector<8x512xf32> to vector<8x384xf32>
    %70 = arith.negf %69 : vector<8x384xf32>
    %71 = math.exp %70 : vector<8x384xf32>
    %cst_27 = arith.constant 1.000000e+00 : f32
    %72 = vector.broadcast %cst_27 : f32 to vector<8x384xf32>
    %73 = arith.addf %72, %71 : vector<8x384xf32>
    %74 = arith.divf %72, %73 : vector<8x384xf32>
    %75 = vector.extract_strided_slice %74 {offsets = [0, 0], sizes = [8, 128], strides = [1, 1]} : vector<8x384xf32> to vector<8x128xf32>
    %76 = vector.extract_strided_slice %74 {offsets = [0, 128], sizes = [8, 128], strides = [1, 1]} : vector<8x384xf32> to vector<8x128xf32>
    %77 = vector.extract_strided_slice %74 {offsets = [0, 256], sizes = [8, 128], strides = [1, 1]} : vector<8x384xf32> to vector<8x128xf32>
    %78 = arith.mulf %68, %75 : vector<8x128xf32>
    %79 = arith.mulf %58, %76 : vector<8x128xf32>
    %80 = arith.addf %78, %79 : vector<8x128xf32>
    %81 = math.tanh %80 : vector<8x128xf32>
    %82 = arith.mulf %81, %77 : vector<8x128xf32>
    %c3_i32 = arith.constant 3 : i32
    %83 = arith.index_cast %c3_i32 : i32 to index
    %c0_28 = arith.constant 0 : index
    %c0_29 = arith.constant 0 : index
    %84 = vector.load %arg8[%83, %c0_28, %c0_29] : memref<8x8x512xf32, #tpu.memory_space<vmem>>, vector<1x8x512xf32>
    %85 = vector.shape_cast %84 : vector<1x8x512xf32> to vector<8x512xf32>
    %86 = arith.truncf %82 : vector<8x128xf32> to vector<8x128xbf16>
    %cst_30 = arith.constant dense<0.000000e+00> : vector<8x512xf32>
    %87 = tpu.matmul %86, %14, %cst_30 {dimension_numbers = #tpu.dot_dimension_numbers<[1], [0], [0], [1], [0, 0, 1, 1], [], []>} : vector<8x128xbf16>, vector<128x512xbf16>, vector<8x512xf32> -> vector<8x512xf32>
    %88 = arith.addf %85, %87 : vector<8x512xf32>
    %89 = vector.extract_strided_slice %88 {offsets = [0, 0], sizes = [8, 128], strides = [1, 1]} : vector<8x512xf32> to vector<8x128xf32>
    %90 = math.tanh %89 : vector<8x128xf32>
    %91 = vector.extract_strided_slice %88 {offsets = [0, 128], sizes = [8, 384], strides = [1, 1]} : vector<8x512xf32> to vector<8x384xf32>
    %92 = arith.negf %91 : vector<8x384xf32>
    %93 = math.exp %92 : vector<8x384xf32>
    %cst_31 = arith.constant 1.000000e+00 : f32
    %94 = vector.broadcast %cst_31 : f32 to vector<8x384xf32>
    %95 = arith.addf %94, %93 : vector<8x384xf32>
    %96 = arith.divf %94, %95 : vector<8x384xf32>
    %97 = vector.extract_strided_slice %96 {offsets = [0, 0], sizes = [8, 128], strides = [1, 1]} : vector<8x384xf32> to vector<8x128xf32>
    %98 = vector.extract_strided_slice %96 {offsets = [0, 128], sizes = [8, 128], strides = [1, 1]} : vector<8x384xf32> to vector<8x128xf32>
    %99 = vector.extract_strided_slice %96 {offsets = [0, 256], sizes = [8, 128], strides = [1, 1]} : vector<8x384xf32> to vector<8x128xf32>
    %100 = arith.mulf %90, %97 : vector<8x128xf32>
    %101 = arith.mulf %80, %98 : vector<8x128xf32>
    %102 = arith.addf %100, %101 : vector<8x128xf32>
    %103 = math.tanh %102 : vector<8x128xf32>
    %104 = arith.mulf %103, %99 : vector<8x128xf32>
    %c4_i32 = arith.constant 4 : i32
    %105 = arith.index_cast %c4_i32 : i32 to index
    %c0_32 = arith.constant 0 : index
    %c0_33 = arith.constant 0 : index
    %106 = vector.load %arg8[%105, %c0_32, %c0_33] : memref<8x8x512xf32, #tpu.memory_space<vmem>>, vector<1x8x512xf32>
    %107 = vector.shape_cast %106 : vector<1x8x512xf32> to vector<8x512xf32>
    %108 = arith.truncf %104 : vector<8x128xf32> to vector<8x128xbf16>
    %cst_34 = arith.constant dense<0.000000e+00> : vector<8x512xf32>
    %109 = tpu.matmul %108, %14, %cst_34 {dimension_numbers = #tpu.dot_dimension_numbers<[1], [0], [0], [1], [0, 0, 1, 1], [], []>} : vector<8x128xbf16>, vector<128x512xbf16>, vector<8x512xf32> -> vector<8x512xf32>
    %110 = arith.addf %107, %109 : vector<8x512xf32>
    %111 = vector.extract_strided_slice %110 {offsets = [0, 0], sizes = [8, 128], strides = [1, 1]} : vector<8x512xf32> to vector<8x128xf32>
    %112 = math.tanh %111 : vector<8x128xf32>
    %113 = vector.extract_strided_slice %110 {offsets = [0, 128], sizes = [8, 384], strides = [1, 1]} : vector<8x512xf32> to vector<8x384xf32>
    %114 = arith.negf %113 : vector<8x384xf32>
    %115 = math.exp %114 : vector<8x384xf32>
    %cst_35 = arith.constant 1.000000e+00 : f32
    %116 = vector.broadcast %cst_35 : f32 to vector<8x384xf32>
    %117 = arith.addf %116, %115 : vector<8x384xf32>
    %118 = arith.divf %116, %117 : vector<8x384xf32>
    %119 = vector.extract_strided_slice %118 {offsets = [0, 0], sizes = [8, 128], strides = [1, 1]} : vector<8x384xf32> to vector<8x128xf32>
    %120 = vector.extract_strided_slice %118 {offsets = [0, 128], sizes = [8, 128], strides = [1, 1]} : vector<8x384xf32> to vector<8x128xf32>
    %121 = vector.extract_strided_slice %118 {offsets = [0, 256], sizes = [8, 128], strides = [1, 1]} : vector<8x384xf32> to vector<8x128xf32>
    %122 = arith.mulf %112, %119 : vector<8x128xf32>
    %123 = arith.mulf %102, %120 : vector<8x128xf32>
    %124 = arith.addf %122, %123 : vector<8x128xf32>
    %125 = math.tanh %124 : vector<8x128xf32>
    %126 = arith.mulf %125, %121 : vector<8x128xf32>
    %c5_i32 = arith.constant 5 : i32
    %127 = arith.index_cast %c5_i32 : i32 to index
    %c0_36 = arith.constant 0 : index
    %c0_37 = arith.constant 0 : index
    %128 = vector.load %arg8[%127, %c0_36, %c0_37] : memref<8x8x512xf32, #tpu.memory_space<vmem>>, vector<1x8x512xf32>
    %129 = vector.shape_cast %128 : vector<1x8x512xf32> to vector<8x512xf32>
    %130 = arith.truncf %126 : vector<8x128xf32> to vector<8x128xbf16>
    %cst_38 = arith.constant dense<0.000000e+00> : vector<8x512xf32>
    %131 = tpu.matmul %130, %14, %cst_38 {dimension_numbers = #tpu.dot_dimension_numbers<[1], [0], [0], [1], [0, 0, 1, 1], [], []>} : vector<8x128xbf16>, vector<128x512xbf16>, vector<8x512xf32> -> vector<8x512xf32>
    %132 = arith.addf %129, %131 : vector<8x512xf32>
    %133 = vector.extract_strided_slice %132 {offsets = [0, 0], sizes = [8, 128], strides = [1, 1]} : vector<8x512xf32> to vector<8x128xf32>
    %134 = math.tanh %133 : vector<8x128xf32>
    %135 = vector.extract_strided_slice %132 {offsets = [0, 128], sizes = [8, 384], strides = [1, 1]} : vector<8x512xf32> to vector<8x384xf32>
    %136 = arith.negf %135 : vector<8x384xf32>
    %137 = math.exp %136 : vector<8x384xf32>
    %cst_39 = arith.constant 1.000000e+00 : f32
    %138 = vector.broadcast %cst_39 : f32 to vector<8x384xf32>
    %139 = arith.addf %138, %137 : vector<8x384xf32>
    %140 = arith.divf %138, %139 : vector<8x384xf32>
    %141 = vector.extract_strided_slice %140 {offsets = [0, 0], sizes = [8, 128], strides = [1, 1]} : vector<8x384xf32> to vector<8x128xf32>
    %142 = vector.extract_strided_slice %140 {offsets = [0, 128], sizes = [8, 128], strides = [1, 1]} : vector<8x384xf32> to vector<8x128xf32>
    %143 = vector.extract_strided_slice %140 {offsets = [0, 256], sizes = [8, 128], strides = [1, 1]} : vector<8x384xf32> to vector<8x128xf32>
    %144 = arith.mulf %134, %141 : vector<8x128xf32>
    %145 = arith.mulf %124, %142 : vector<8x128xf32>
    %146 = arith.addf %144, %145 : vector<8x128xf32>
    %147 = math.tanh %146 : vector<8x128xf32>
    %148 = arith.mulf %147, %143 : vector<8x128xf32>
    %c6_i32 = arith.constant 6 : i32
    %149 = arith.index_cast %c6_i32 : i32 to index
    %c0_40 = arith.constant 0 : index
    %c0_41 = arith.constant 0 : index
    %150 = vector.load %arg8[%149, %c0_40, %c0_41] : memref<8x8x512xf32, #tpu.memory_space<vmem>>, vector<1x8x512xf32>
    %151 = vector.shape_cast %150 : vector<1x8x512xf32> to vector<8x512xf32>
    %152 = arith.truncf %148 : vector<8x128xf32> to vector<8x128xbf16>
    %cst_42 = arith.constant dense<0.000000e+00> : vector<8x512xf32>
    %153 = tpu.matmul %152, %14, %cst_42 {dimension_numbers = #tpu.dot_dimension_numbers<[1], [0], [0], [1], [0, 0, 1, 1], [], []>} : vector<8x128xbf16>, vector<128x512xbf16>, vector<8x512xf32> -> vector<8x512xf32>
    %154 = arith.addf %151, %153 : vector<8x512xf32>
    %155 = vector.extract_strided_slice %154 {offsets = [0, 0], sizes = [8, 128], strides = [1, 1]} : vector<8x512xf32> to vector<8x128xf32>
    %156 = math.tanh %155 : vector<8x128xf32>
    %157 = vector.extract_strided_slice %154 {offsets = [0, 128], sizes = [8, 384], strides = [1, 1]} : vector<8x512xf32> to vector<8x384xf32>
    %158 = arith.negf %157 : vector<8x384xf32>
    %159 = math.exp %158 : vector<8x384xf32>
    %cst_43 = arith.constant 1.000000e+00 : f32
    %160 = vector.broadcast %cst_43 : f32 to vector<8x384xf32>
    %161 = arith.addf %160, %159 : vector<8x384xf32>
    %162 = arith.divf %160, %161 : vector<8x384xf32>
    %163 = vector.extract_strided_slice %162 {offsets = [0, 0], sizes = [8, 128], strides = [1, 1]} : vector<8x384xf32> to vector<8x128xf32>
    %164 = vector.extract_strided_slice %162 {offsets = [0, 128], sizes = [8, 128], strides = [1, 1]} : vector<8x384xf32> to vector<8x128xf32>
    %165 = vector.extract_strided_slice %162 {offsets = [0, 256], sizes = [8, 128], strides = [1, 1]} : vector<8x384xf32> to vector<8x128xf32>
    %166 = arith.mulf %156, %163 : vector<8x128xf32>
    %167 = arith.mulf %146, %164 : vector<8x128xf32>
    %168 = arith.addf %166, %167 : vector<8x128xf32>
    %169 = math.tanh %168 : vector<8x128xf32>
    %170 = arith.mulf %169, %165 : vector<8x128xf32>
    %c7_i32 = arith.constant 7 : i32
    %171 = arith.index_cast %c7_i32 : i32 to index
    %c0_44 = arith.constant 0 : index
    %c0_45 = arith.constant 0 : index
    %172 = vector.load %arg8[%171, %c0_44, %c0_45] : memref<8x8x512xf32, #tpu.memory_space<vmem>>, vector<1x8x512xf32>
    %173 = vector.shape_cast %172 : vector<1x8x512xf32> to vector<8x512xf32>
    %174 = arith.truncf %170 : vector<8x128xf32> to vector<8x128xbf16>
    %cst_46 = arith.constant dense<0.000000e+00> : vector<8x512xf32>
    %175 = tpu.matmul %174, %14, %cst_46 {dimension_numbers = #tpu.dot_dimension_numbers<[1], [0], [0], [1], [0, 0, 1, 1], [], []>} : vector<8x128xbf16>, vector<128x512xbf16>, vector<8x512xf32> -> vector<8x512xf32>
    %176 = arith.addf %173, %175 : vector<8x512xf32>
    %177 = vector.extract_strided_slice %176 {offsets = [0, 0], sizes = [8, 128], strides = [1, 1]} : vector<8x512xf32> to vector<8x128xf32>
    %178 = math.tanh %177 : vector<8x128xf32>
    %179 = vector.extract_strided_slice %176 {offsets = [0, 128], sizes = [8, 384], strides = [1, 1]} : vector<8x512xf32> to vector<8x384xf32>
    %180 = arith.negf %179 : vector<8x384xf32>
    %181 = math.exp %180 : vector<8x384xf32>
    %cst_47 = arith.constant 1.000000e+00 : f32
    %182 = vector.broadcast %cst_47 : f32 to vector<8x384xf32>
    %183 = arith.addf %182, %181 : vector<8x384xf32>
    %184 = arith.divf %182, %183 : vector<8x384xf32>
    %185 = vector.extract_strided_slice %184 {offsets = [0, 0], sizes = [8, 128], strides = [1, 1]} : vector<8x384xf32> to vector<8x128xf32>
    %186 = vector.extract_strided_slice %184 {offsets = [0, 128], sizes = [8, 128], strides = [1, 1]} : vector<8x384xf32> to vector<8x128xf32>
    %187 = vector.extract_strided_slice %184 {offsets = [0, 256], sizes = [8, 128], strides = [1, 1]} : vector<8x384xf32> to vector<8x128xf32>
    %188 = arith.mulf %178, %185 : vector<8x128xf32>
    %189 = arith.mulf %168, %186 : vector<8x128xf32>
    %190 = arith.addf %188, %189 : vector<8x128xf32>
    %191 = math.tanh %190 : vector<8x128xf32>
    %192 = arith.mulf %191, %187 : vector<8x128xf32>
    %c8_i32 = arith.constant 8 : i32
    %c0_48 = arith.constant 0 : index
    %c0_49 = arith.constant 0 : index
    %193 = vector.load %arg9[%c0_48, %c0_49] : memref<8x128xf32, #tpu.memory_space<vmem>>, vector<8x128xf32>
    tpu.vector_store %arg9[%c0_48, %c0_49], %192 {strides = array<i32>} : memref<8x128xf32, #tpu.memory_space<vmem>>, vector<8x128xf32>,
    %c0_50 = arith.constant 0 : index
    %c0_51 = arith.constant 0 : index
    %194 = vector.load %arg10[%c0_50, %c0_51] : memref<8x128xf32, #tpu.memory_space<vmem>>, vector<8x128xf32>
    tpu.vector_store %arg10[%c0_50, %c0_51], %190 {strides = array<i32>} : memref<8x128xf32, #tpu.memory_space<vmem>>, vector<8x128xf32>,
    %c0_i32_52 = arith.constant 0 : i32
    %195 = arith.cmpi eq, %arg0, %c0_i32_52 : i32
    %196 = arith.extui %195 : i1 to i32
    %c0_i32_53 = arith.constant 0 : i32
    %197 = arith.cmpi ne, %196, %c0_i32_53 : i32
    scf.if %197 {
      %198 = arith.truncf %192 : vector<8x128xf32> to vector<8x128xbf16>
      %c0_54 = arith.constant 0 : index
      %c0_55 = arith.constant 0 : index
      %199 = vector.load %arg5[%c0_54, %c0_55] : memref<128x128xbf16, #tpu.memory_space<vmem>>, vector<128x128xbf16>
      %cst_56 = arith.constant dense<0.000000e+00> : vector<8x128xf32>
      %200 = tpu.matmul %198, %199, %cst_56 {dimension_numbers = #tpu.dot_dimension_numbers<[1], [0], [0], [1], [0, 0, 1, 1], [], []>} : vector<8x128xbf16>, vector<128x128xbf16>, vector<8x128xf32> -> vector<8x128xf32>
      %c0_57 = arith.constant 0 : index
      %c0_58 = arith.constant 0 : index
      %201 = vector.load %arg6[%c0_57, %c0_58] : memref<1x128xf32, #tpu.memory_space<vmem>>, vector<1x128xf32>
      %202 = vector.broadcast %201 : vector<1x128xf32> to vector<8x128xf32>
      %203 = arith.addf %200, %202 : vector<8x128xf32>
      %c0_59 = arith.constant 0 : index
      %c0_60 = arith.constant 0 : index
      %204 = vector.load %arg7[%c0_59, %c0_60] : memref<8x128xf32, #tpu.memory_space<vmem>>, vector<8x128xf32>
      tpu.vector_store %arg7[%c0_59, %c0_60], %203 {strides = array<i32>} : memref<8x128xf32, #tpu.memory_space<vmem>>, vector<8x128xf32>,
    } else {
    }
    return
  }
  func.func @transform_0(%arg0: i32) -> (i32, i32, i32) {
    %c0_i32 = arith.constant 0 : i32
    %c0_i32_0 = arith.constant 0 : i32
    %c0_i32_1 = arith.constant 0 : i32
    return %arg0, %c0_i32, %c0_i32_0 : i32, i32, i32
  }
  func.func @transform_1(%arg0: i32) -> (i32, i32) {
    %c0_i32 = arith.constant 0 : i32
    %c0_i32_0 = arith.constant 0 : i32
    %c0_i32_1 = arith.constant 0 : i32
    return %c0_i32, %c0_i32_0 : i32, i32
  }
  func.func @transform_2(%arg0: i32) -> (i32, i32) {
    %c0_i32 = arith.constant 0 : i32
    %c0_i32_0 = arith.constant 0 : i32
    %c0_i32_1 = arith.constant 0 : i32
    return %c0_i32, %c0_i32_0 : i32, i32
  }
  func.func @transform_3(%arg0: i32) -> (i32, i32) {
    %c0_i32 = arith.constant 0 : i32
    %c0_i32_0 = arith.constant 0 : i32
    %c0_i32_1 = arith.constant 0 : i32
    return %c0_i32, %c0_i32_0 : i32, i32
  }
  func.func @transform_4(%arg0: i32) -> (i32, i32) {
    %c0_i32 = arith.constant 0 : i32
    %c0_i32_0 = arith.constant 0 : i32
    %c0_i32_1 = arith.constant 0 : i32
    return %c0_i32, %c0_i32_0 : i32, i32
  }
  func.func @transform_5(%arg0: i32) -> (i32, i32) {
    %c0_i32 = arith.constant 0 : i32
    %c0_i32_0 = arith.constant 0 : i32
    %c0_i32_1 = arith.constant 0 : i32
    return %c0_i32, %c0_i32_0 : i32, i32
  }
  func.func @transform_6(%arg0: i32) -> (i32, i32) {
    %c0_i32 = arith.constant 0 : i32
    %c0_i32_0 = arith.constant 0 : i32
    %c0_i32_1 = arith.constant 0 : i32
    return %c0_i32, %c0_i32_0 : i32, i32
  }
}

</mosaic_0001>

<bundles_post_ra>
// kernel: lstm_forward.1
= control target key start
LH: loop header
LB: loop body
LE: loop exit
PB: predicated region body
PF: predicated region fallthrough
CT: control target
= control target key end

     0   :  { %11 = vsyncpa [#allocation6], 0  ;;  %s1819_s21 = smov [#allocation5]   ;;  %s2431_s0 = inlined_call_operand.vmem [shape: f32[8,8,1], index: 0, kind: input, shape index: {}]   ;;  %s2432_s1 = inlined_call_operand.vmem [shape: f32[1,512], index: 1, kind: input, shape index: {}]   ;;  %s2433_s2 = inlined_call_operand.hbm [shape: bf16[128,512], index: 2, kind: input, shape index: {}]   ;;  %s2434_s3 = inlined_call_operand.vmem [shape: f32[1,512], index: 3, kind: input, shape index: {}]   ;;  %s2435_s4 = inlined_call_operand.vmem [shape: bf16[128,128], index: 4, kind: input, shape index: {}]   ;;  %s2436_s5 = inlined_call_operand.vmem [shape: f32[1,128], index: 5, kind: input, shape index: {}]   ;;  %s2437_s6 = inlined_call_operand.vmem [shape: f32[8,128], index: 6, kind: output, shape index: {}]  }
   0x1   :  { %s21_s22 = sshll.u32 %s1819_s21, 4  ;;  %s1795_s25 = scalar_lea.hbm %s2433_s2, 4096  ;;  %s22_s22 = int_to_ptr.vmem [resolvable:$true] %s21_s22 }
   0x2   :  { %p1796_p0 = scmp.ne.s32.totalorder %s2433_s2, %s1795_s25  ;;  %p1799_p1 = scmp.lt.u32.totalorder %s1795_s25, %s2433_s2 }
   0x4   :  { %p1801_p2 = pnand %p1799_p1, %p1796_p0 }
   0x6   :  { %1804 = shalt.err (!%p1801_p2)
}
   0x7   :  { %s1805_s30 = scalar_lea.vmem %s22_s22, 4096  ;;  %p1810_p4 = scmp.lt.s32.totalorder %s22_s22, %s22_s22 }
   0x8   :  { %p1806_p3 = scmp.ne.s32.totalorder %s22_s22, %s1805_s30  ;;  %p1811_p5 = scmp.lt.s32.totalorder %s1805_s30, %s1805_s30 }
   0xa   :  { %p1812_p6 = por %p1811_p5, %p1810_p4 }
   0xc   :  { %p1813_p7 = pnand %p1812_p6, %p1806_p3 }
   0xe   :  { %1816 = shalt.err (!%p1813_p7)
}
   0xf   :  { %s1820_s7 = smov 256   ;;  %s1821_s8 = smov 16  }
  0x10   :  { %27 = dma.hbm_to_vmem [thread:$0]  %s2433_s2, 4096, %s22_s22, [#allocation6], %s1820_s7, %s1820_s7, %s1821_s8  }
  0x11   :  { %1817 = dma.done.wait [#allocation6], 4096  }
  0x12   :  { %1818 = vsyncadd [#allocation6], 4294963200  ;;  %v1822_v0 = vmov 0   ;;  %v1877_v1 = vld [vmem:[#allocation5 + $0x4] ss:$16 sps:$4 sm:$0xff]   ;;  %v45_v30 = vld [vmem:[%s2431_s0 + $0x8] sm:$0xff]  ;;  %v94_v38 = vlaneseq }
  0x13   :  { %463 = vmatprep.mubr.bf16.mxu0 %v1822_v0  ;;  %504 = vmatprep.mubr.bf16.mxu1 %v1822_v0  ;;  %v1879_v2 = vld [vmem:[#allocation5 + $0xc] ss:$16 sps:$4 sm:$0xff]   ;;  %v1882_v3 = vld [vmem:[#allocation5] ss:$16 sps:$4 sm:$0xff]   ;;  %v1884_v4 = vld [vmem:[#allocation5 + $0x8] ss:$16 sps:$4 sm:$0xff]  }
  0x14   :  { %1577 = vset.pattern.permute.xlu0 %v1822_v0  ;;  %1578 = vset.pattern.permute.xlu1 %v1822_v0  ;;  %v1887_v5 = vld [vmem:[#allocation5 + $0x24] ss:$16 sps:$4 sm:$0xff]   ;;  %v1891_v6 = vld [vmem:[#allocation5 + $0x2c] ss:$16 sps:$4 sm:$0xff]   ;;  %v1893_v7 = vld [vmem:[#allocation5 + $0x20] ss:$16 sps:$4 sm:$0xff]  }
  0x15   :  { %431 = vmatprep.subr.bf16.mxu0 %v1877_v1  ;;  %472 = vmatprep.subr.bf16.mxu1 %v1879_v2  ;;  %v1896_v8 = vld [vmem:[#allocation5 + $0x28] ss:$16 sps:$4 sm:$0xff]   ;;  %v1899_v9 = vld [vmem:[#allocation5 + $0x44] ss:$16 sps:$4 sm:$0xff]   ;;  %v1901_v10 = vld [vmem:[#allocation5 + $0x4c] ss:$16 sps:$4 sm:$0xff]  }
  0x16   :  { %432 = vmatpush1.bf16.msra.mxu0 %v1882_v3  ;;  %473 = vmatpush1.bf16.msra.mxu1 %v1884_v4  ;;  %v1903_v11 = vld [vmem:[#allocation5 + $0x40] ss:$16 sps:$4 sm:$0xff]   ;;  %v1905_v12 = vld [vmem:[#allocation5 + $0x48] ss:$16 sps:$4 sm:$0xff]   ;;  %v1909_v13 = vld [vmem:[#allocation5 + $0x64] ss:$16 sps:$4 sm:$0xff]  }
  0x17   :  { %433 = vmatprep.subr.bf16.mxu0 %v1887_v5  ;;  %474 = vmatprep.subr.bf16.mxu1 %v1891_v6  ;;  %v1913_v14 = vld [vmem:[#allocation5 + $0x6c] ss:$16 sps:$4 sm:$0xff]   ;;  %v1915_v15 = vld [vmem:[#allocation5 + $0x60] ss:$16 sps:$4 sm:$0xff]   ;;  %v1919_v16 = vld [vmem:[#allocation5 + $0x68] ss:$16 sps:$4 sm:$0xff]  }
  0x18   :  { %v1921_v17 = vld [vmem:[#allocation5 + $0x84] ss:$16 sps:$4 sm:$0xff]   ;;  %v1925_v18 = vld [vmem:[#allocation5 + $0x8c] ss:$16 sps:$4 sm:$0xff]   ;;  %v1927_v19 = vld [vmem:[#allocation5 + $0x80] ss:$16 sps:$4 sm:$0xff]  }
  0x19   :  { %v1929_v20 = vld [vmem:[#allocation5 + $0x88] ss:$16 sps:$4 sm:$0xff]   ;;  %v1933_v21 = vld [vmem:[#allocation5 + $0xa4] ss:$16 sps:$4 sm:$0xff]   ;;  %v1937_v22 = vld [vmem:[#allocation5 + $0xac] ss:$16 sps:$4 sm:$0xff]  }
  0x1a   :  { %434 = vmatpush1.bf16.msra.mxu0 %v1893_v7  ;;  %475 = vmatpush1.bf16.msra.mxu1 %v1896_v8  ;;  %v1941_v23 = vld [vmem:[#allocation5 + $0xa0] ss:$16 sps:$4 sm:$0xff]   ;;  %v1943_v24 = vld [vmem:[#allocation5 + $0xa8] ss:$16 sps:$4 sm:$0xff]   ;;  %v1947_v25 = vld [vmem:[#allocation5 + $0xc4] ss:$16 sps:$4 sm:$0xff]  }
  0x1b   :  { %435 = vmatprep.subr.bf16.mxu0 %v1899_v9  ;;  %476 = vmatprep.subr.bf16.mxu1 %v1901_v10  ;;  %v1949_v26 = vld [vmem:[#allocation5 + $0xcc] ss:$16 sps:$4 sm:$0xff]   ;;  %v44_v27 = vld [vmem:[%s2431_s0] sm:$0xff]  ;;  %v1956_v29 = vld [vmem:[#allocation5 + $0xc8] ss:$16 sps:$4 sm:$0xff]   ;;  %v1823_v37 = vmov 0.0|0.0  }
  0x1c   :  { %v1954_v28 = vld [vmem:[#allocation5 + $0xc0] ss:$16 sps:$4 sm:$0xff]   ;;  %55 = vperm.xlu0 %1577, %v44_v27   ;;  %v1961_v31 = vld [vmem:[#allocation5 + $0xe4] ss:$16 sps:$4 sm:$0xff]   ;;  %v1963_v32 = vld [vmem:[#allocation5 + $0xec] ss:$16 sps:$4 sm:$0xff]  }
  0x1d   :  { %v48_v33 = vld [vmem:[%s2431_s0 + $0x20] sm:$0xff]  ;;  %v1976_v35 = vld [vmem:[#allocation5 + $0xe8] ss:$16 sps:$4 sm:$0xff]   ;;  %v50_v36 = vld [vmem:[%s2431_s0 + $0x30] sm:$0xff]  ;;  %v95_v39 = vshrl.u32 %v94_v38, 7  ;;  %vm1825_vm0 = vmmov 0  }
  0x1e   :  { %436 = vmatpush1.bf16.msra.mxu0 %v1903_v11  ;;  %477 = vmatpush1.bf16.msra.mxu1 %v1905_v12  ;;  %v1974_v34 = vld [vmem:[#allocation5 + $0xe0] ss:$16 sps:$4 sm:$0xff]  }
  0x1f   :  { %437 = vmatprep.subr.bf16.mxu0 %v1909_v13  ;;  %478 = vmatprep.subr.bf16.mxu1 %v1913_v14  ;;  %v104_v40 = vsub.s32 2, %v95_v39  ;;  %v52_v41 = vld [vmem:[%s2432_s1] sm:$0xf]  ;;  %v100_v42 = vsub.s32 1, %v95_v39  ;;  %v108_v47 = vsub.s32 3, %v95_v39  ;;  %v96_v53 = vsub.s32 0, %v95_v39 }
  0x20   :  { %60 = vperm.xlu0 %1577, %v45_v30   ;;  %v146_v45 = vld [vmem:[%s2434_s3] sm:$0xf] }
  0x21   :  { %v2024_v43 = vrot.slane %v52_v41, %v104_v40  ;;  %v2026_v44 = vrot.slane %v52_v41, %v100_v42  ;;  %v2032_v49 = vrot.slane %v146_v45, %v104_v40  ;;  %v2035_v51 = vrot.slane %v146_v45, %v100_v42 }
  0x22   :  { %438 = vmatpush1.bf16.msra.mxu0 %v1915_v15  ;;  %479 = vmatpush1.bf16.msra.mxu1 %v1919_v16  ;;  %v2037_v52 = vrot.slane %v52_v41, %v108_v47  ;;  %v2042_v59 = vrot.slane %v146_v45, %v108_v47  ;;  %v2044_v60 = vrot.slane %v52_v41, %v96_v53 }
  0x23   :  { %439 = vmatprep.subr.bf16.mxu0 %v1921_v17  ;;  %480 = vmatprep.subr.bf16.mxu1 %v1925_v18 }
  0x24   :  { %75 = vperm.xlu0 %1577, %v48_v33  }
  0x26   :  { %440 = vmatpush1.bf16.msra.mxu0 %v1927_v19  ;;  %481 = vmatpush1.bf16.msra.mxu1 %v1929_v20 }
  0x27   :  { %441 = vmatprep.subr.bf16.mxu0 %v1933_v21  ;;  %482 = vmatprep.subr.bf16.mxu1 %v1937_v22 }
  0x28   :  { %85 = vperm.xlu0 %1577, %v50_v36  }
  0x2a   :  { %442 = vmatpush1.bf16.msra.mxu0 %v1941_v23  ;;  %483 = vmatpush1.bf16.msra.mxu1 %v1943_v24 }
  0x2b   :  { %443 = vmatprep.subr.bf16.mxu0 %v1947_v25  ;;  %484 = vmatprep.subr.bf16.mxu1 %v1949_v26 }
  0x2e   :  { %444 = vmatpush1.bf16.msra.mxu0 %v1954_v28  ;;  %485 = vmatpush1.bf16.msra.mxu1 %v1956_v29 }
  0x2f   :  { %445 = vmatprep.subr.bf16.mxu0 %v1961_v31  ;;  %486 = vmatprep.subr.bf16.mxu1 %v1963_v32 }
  0x32   :  { %446 = vmatpush1.bf16.msra.mxu0 %v1974_v34  ;;  %487 = vmatpush1.bf16.msra.mxu1 %v1976_v35 }
  0x33   :  { %547 = vmatprep.subr.bf16.mxu0 %v1877_v1  ;;  %588 = vmatprep.subr.bf16.mxu1 %v1879_v2 }
  0x35   :  { %464 = vmatmul.mubr.bf16.vlgmr.msra.gmra.mrb[0].mxu0 %v1823_v37  ;;  %505 = vmatmul.mubr.bf16.vlgmr.msra.gmra.mrb[0].mxu1 %v1823_v37 }
  0x36   :  { %548 = vmatpush1.bf16.msra.mxu0 %v1882_v3  ;;  %589 = vmatpush1.bf16.msra.mxu1 %v1884_v4 }
  0x37   :  { %549 = vmatprep.subr.bf16.mxu0 %v1887_v5  ;;  %590 = vmatprep.subr.bf16.mxu1 %v1891_v6 }
  0x38   :  { %579 = vmatprep.mubr.bf16.mxu0 %v1822_v0  ;;  %620 = vmatprep.mubr.bf16.mxu1 %v1822_v0 }
  0x3a   :  { %550 = vmatpush1.bf16.msra.mxu0 %v1893_v7  ;;  %591 = vmatpush1.bf16.msra.mxu1 %v1896_v8 }
  0x3b   :  { %551 = vmatprep.subr.bf16.mxu0 %v1899_v9  ;;  %592 = vmatprep.subr.bf16.mxu1 %v1901_v10 }
  0x3e   :  { %552 = vmatpush1.bf16.msra.mxu0 %v1903_v11  ;;  %593 = vmatpush1.bf16.msra.mxu1 %v1905_v12 }
  0x3f   :  { %553 = vmatprep.subr.bf16.mxu0 %v1909_v13  ;;  %594 = vmatprep.subr.bf16.mxu1 %v1913_v14 }
  0x42   :  { %554 = vmatpush1.bf16.msra.mxu0 %v1915_v15  ;;  %595 = vmatpush1.bf16.msra.mxu1 %v1919_v16 }
  0x43   :  { %555 = vmatprep.subr.bf16.mxu0 %v1921_v17  ;;  %596 = vmatprep.subr.bf16.mxu1 %v1925_v18 }
  0x46   :  { %556 = vmatpush1.bf16.msra.mxu0 %v1927_v19  ;;  %597 = vmatpush1.bf16.msra.mxu1 %v1929_v20 }
  0x47   :  { %557 = vmatprep.subr.bf16.mxu0 %v1933_v21  ;;  %598 = vmatprep.subr.bf16.mxu1 %v1937_v22 }
  0x4a   :  { %558 = vmatpush1.bf16.msra.mxu0 %v1941_v23  ;;  %599 = vmatpush1.bf16.msra.mxu1 %v1943_v24 }
  0x4b   :  { %559 = vmatprep.subr.bf16.mxu0 %v1947_v25  ;;  %600 = vmatprep.subr.bf16.mxu1 %v1949_v26 }
  0x4e   :  { %560 = vmatpush1.bf16.msra.mxu0 %v1954_v28  ;;  %601 = vmatpush1.bf16.msra.mxu1 %v1956_v29 }
  0x4f   :  { %561 = vmatprep.subr.bf16.mxu0 %v1961_v31  ;;  %602 = vmatprep.subr.bf16.mxu1 %v1963_v32 }
  0x52   :  { %562 = vmatpush1.bf16.msra.mxu0 %v1974_v34  ;;  %603 = vmatpush1.bf16.msra.mxu1 %v1976_v35 }
  0x53   :  { %663 = vmatprep.subr.bf16.mxu0 %v1877_v1  ;;  %704 = vmatprep.subr.bf16.mxu1 %v1879_v2 }
  0x9b   :  { %v56_v46 = vpop.permute.xlu0 %55 }
  0x9c   :  { %v116_v48 = vmul.f32 %v2024_v43, %v56_v46  ;;  %v115_v50 = vmul.f32 %v2026_v44, %v56_v46  ;;  %v117_v58 = vmul.f32 %v2037_v52, %v56_v46  ;;  %v114_v42 = vmul.f32 %v2044_v60, %v56_v46 }
  0x9e   :  { %v170_v54 = vadd.f32 %v2032_v49, %v116_v48  ;;  %v169_v55 = vadd.f32 %v2035_v51, %v115_v50  ;;  %v171_v40 = vadd.f32 %v2042_v59, %v117_v58  ;;  %v2048_v48 = vrot.slane %v146_v45, %v96_v53 }
  0xa0   :  { %v168_v47 = vadd.f32 %v2048_v48, %v114_v42  ;;  %v49_v42 = vld [vmem:[%s2431_s0 + $0x28] sm:$0xff] }
 0x108   :  { %v465_v56 = vpop.f32.mrb[0].mxu0  ;;  %v506_v57 = vpop.f32.mrb[0].mxu1 }
 0x109   :  { %v515_v61 = vadd.f32 %v506_v57, %v170_v54  ;;  %v467_v62 = vpop.f32.mrb[1].mxu0  ;;  %v508_v63 = vpop.f32.mrb[1].mxu1  ;;  %v513_v54 = vadd.f32 %v465_v56, %v168_v47 }
 0x10a   :  { %v514_v27 = vadd.f32 %v467_v62, %v169_v55  ;;  %v469_v30 = vpop.f32.mrb[2].mxu0  ;;  %v510_v33 = vpop.f32.mrb[2].mxu1  ;;  %v516_v41 = vadd.f32 %v508_v63, %v171_v40  ;;  %v47_v40 = vld [vmem:[%s2431_s0 + $0x18] sm:$0xff] }
 0x10b   :  { %v1509_v36 = vmul.f32 -1.442695, %v515_v61  ;;  %v470_v37 = vpop.f32.mrb[3].mxu0  ;;  %v511_v38 = vpop.f32.mrb[3].mxu1 }
 0x10c   :  { %v1508_v39 = vmul.f32 -1.442695, %v514_v27  ;;  %v1510_v50 = vmul.f32 -1.442695, %v516_v41  ;;  %v51_v41 = vld [vmem:[%s2431_s0 + $0x38] sm:$0xff]  ;;  %v61_v47 = vpop.permute.xlu0 %60 }
 0x10d   :  { %1635 = vpow2.f32 %v1509_v36 }
 0x10e   :  { %1637 = vpow2.f32 %v1508_v39  ;;  %v46_v39 = vld [vmem:[%s2431_s0 + $0x10] sm:$0xff] }
 0x10f   :  { %1639 = vpow2.f32 %v1510_v50  ;;  %65 = vperm.xlu1 %1578, %v46_v39   ;;  %v120_v50 = vmul.f32 %v2024_v43, %v61_v47 }
 0x110   :  { %1641 = vtanh.f32 %v513_v54  ;;  %v119_v54 = vmul.f32 %v2026_v44, %v61_v47 }
 0x113   :  { %70 = vperm.xlu1 %1578, %v47_v40   ;;  %v118_v40 = vmul.f32 %v2044_v60, %v61_v47 }
 0x117   :  { %v1636_v55 = vpop.eup %1635  ;;  %80 = vperm.xlu1 %1578, %v49_v42  }
 0x118   :  { %v1638_v57 = vpop.eup %1637  ;;  %v528_v62 = vadd.f32 1.0, %v1636_v55  ;;  %v174_v55 = vadd.f32 %v2032_v49, %v120_v50 }
 0x119   :  { %v527_v61 = vadd.f32 1.0, %v1638_v57  ;;  %v1640_v58 = vpop.eup %1639 }
 0x11a   :  { %1643 = vrcp.f32 %v528_v62  ;;  %v1642_v27 = vpop.eup %1641  ;;  %v529_v30 = vadd.f32 1.0, %v1640_v58 }
 0x11b   :  { %1645 = vrcp.f32 %v527_v61  ;;  %90 = vperm.xlu1 %1578, %v51_v41   ;;  %v173_v61 = vadd.f32 %v2035_v51, %v119_v54  ;;  %v172_v41 = vadd.f32 %v2048_v48, %v118_v40 }
 0x11c   :  { %1647 = vrcp.f32 %v529_v30 }
 0x124   :  { %v1644_v46 = vpop.eup %1643 }
 0x125   :  { %v1646_v45 = vpop.eup %1645  ;;  %v537_v53 = vmul.f32 0.0, %v1644_v46 }
 0x126   :  { %v536_v33 = vmul.f32 %v1646_v45, %v1642_v27  ;;  %v1648_v56 = vpop.eup %1647 }
 0x128   :  { %v2051_v63 = vadd.f32 %v537_v53, %v536_v33  ;;  %v121_v53 = vmul.f32 %v2037_v52, %v61_v47 }
 0x12a   :  { %1649 = vtanh.f32 %v2051_v63  ;;  %v175_v39 = vadd.f32 %v2042_v59, %v121_v53 }
 0x134   :  { %v1650_v36 = vpop.eup %1649 }
 0x135   :  { %v540_v37 = vmul.f32 %v1650_v36, %v1648_v56 }
 0x137   :  { %v546_v38 = vpack.c.bf16 %v540_v37, %v540_v37 }
 0x139   :  { %580 = vmatmul.mubr.bf16.vlgmr.msra.gmra.mrb[4].mxu0 %v546_v38  ;;  %621 = vmatmul.mubr.bf16.vlgmr.msra.gmra.mrb[4].mxu1 %v546_v38 }
 0x13a   :  { %664 = vmatpush1.bf16.msra.mxu0 %v1882_v3  ;;  %705 = vmatpush1.bf16.msra.mxu1 %v1884_v4 }
 0x13b   :  { %665 = vmatprep.subr.bf16.mxu0 %v1887_v5  ;;  %706 = vmatprep.subr.bf16.mxu1 %v1891_v6 }
 0x13c   :  { %695 = vmatprep.mubr.bf16.mxu0 %v1822_v0  ;;  %736 = vmatprep.mubr.bf16.mxu1 %v1822_v0 }
 0x13e   :  { %666 = vmatpush1.bf16.msra.mxu0 %v1893_v7  ;;  %707 = vmatpush1.bf16.msra.mxu1 %v1896_v8 }
 0x13f   :  { %667 = vmatprep.subr.bf16.mxu0 %v1899_v9  ;;  %708 = vmatprep.subr.bf16.mxu1 %v1901_v10 }
 0x142   :  { %668 = vmatpush1.bf16.msra.mxu0 %v1903_v11  ;;  %709 = vmatpush1.bf16.msra.mxu1 %v1905_v12 }
 0x143   :  { %669 = vmatprep.subr.bf16.mxu0 %v1909_v13  ;;  %710 = vmatprep.subr.bf16.mxu1 %v1913_v14 }
 0x146   :  { %670 = vmatpush1.bf16.msra.mxu0 %v1915_v15  ;;  %711 = vmatpush1.bf16.msra.mxu1 %v1919_v16 }
 0x147   :  { %671 = vmatprep.subr.bf16.mxu0 %v1921_v17  ;;  %712 = vmatprep.subr.bf16.mxu1 %v1925_v18 }
 0x14a   :  { %672 = vmatpush1.bf16.msra.mxu0 %v1927_v19  ;;  %713 = vmatpush1.bf16.msra.mxu1 %v1929_v20 }
 0x14b   :  { %673 = vmatprep.subr.bf16.mxu0 %v1933_v21  ;;  %714 = vmatprep.subr.bf16.mxu1 %v1937_v22 }
 0x14e   :  { %674 = vmatpush1.bf16.msra.mxu0 %v1941_v23  ;;  %715 = vmatpush1.bf16.msra.mxu1 %v1943_v24 }
 0x14f   :  { %675 = vmatprep.subr.bf16.mxu0 %v1947_v25  ;;  %716 = vmatprep.subr.bf16.mxu1 %v1949_v26 }
 0x152   :  { %676 = vmatpush1.bf16.msra.mxu0 %v1954_v28  ;;  %717 = vmatpush1.bf16.msra.mxu1 %v1956_v29 }
 0x153   :  { %677 = vmatprep.subr.bf16.mxu0 %v1961_v31  ;;  %718 = vmatprep.subr.bf16.mxu1 %v1963_v32 }
 0x156   :  { %678 = vmatpush1.bf16.msra.mxu0 %v1974_v34  ;;  %719 = vmatpush1.bf16.msra.mxu1 %v1976_v35 }
 0x157   :  { %779 = vmatprep.subr.bf16.mxu0 %v1877_v1  ;;  %820 = vmatprep.subr.bf16.mxu1 %v1879_v2 }
 0x20c   :  { %v581_v57 = vpop.f32.mrb[4].mxu0  ;;  %v622_v62 = vpop.f32.mrb[4].mxu1 }
 0x20d   :  { %v631_v58 = vadd.f32 %v622_v62, %v174_v55  ;;  %v583_v27 = vpop.f32.mrb[5].mxu0  ;;  %v624_v46 = vpop.f32.mrb[5].mxu1  ;;  %v629_v54 = vadd.f32 %v581_v57, %v172_v41 }
 0x20e   :  { %v630_v45 = vadd.f32 %v583_v27, %v173_v61  ;;  %v585_v30 = vpop.f32.mrb[6].mxu0  ;;  %v626_v33 = vpop.f32.mrb[6].mxu1  ;;  %v632_v42 = vadd.f32 %v624_v46, %v175_v39 }
 0x20f   :  { %v1512_v56 = vmul.f32 -1.442695, %v631_v58  ;;  %v586_v36 = vpop.f32.mrb[7].mxu0  ;;  %v627_v37 = vpop.f32.mrb[7].mxu1 }
 0x210   :  { %v1511_v38 = vmul.f32 -1.442695, %v630_v45  ;;  %v1513_v50 = vmul.f32 -1.442695, %v632_v42 }
 0x211   :  { %1651 = vpow2.f32 %v1512_v56 }
 0x212   :  { %1653 = vpow2.f32 %v1511_v38 }
 0x213   :  { %1655 = vpow2.f32 %v1513_v50 }
 0x214   :  { %1657 = vtanh.f32 %v629_v54 }
 0x21b   :  { %v1652_v55 = vpop.eup %1651 }
 0x21c   :  { %v1654_v62 = vpop.eup %1653  ;;  %v644_v61 = vadd.f32 1.0, %v1652_v55 }
 0x21d   :  { %v643_v58 = vadd.f32 1.0, %v1654_v62  ;;  %v1656_v27 = vpop.eup %1655 }
 0x21e   :  { %1659 = vrcp.f32 %v644_v61  ;;  %v1658_v45 = vpop.eup %1657  ;;  %v645_v47 = vadd.f32 1.0, %v1656_v27 }
 0x21f   :  { %1661 = vrcp.f32 %v643_v58 }
 0x220   :  { %1663 = vrcp.f32 %v645_v47 }
 0x228   :  { %v1660_v30 = vpop.eup %1659 }
 0x229   :  { %v1662_v33 = vpop.eup %1661  ;;  %v653_v53 = vmul.f32 %v1660_v30, %v2051_v63  ;;  %v66_v63 = vpop.permute.xlu1 %65 }
 0x22a   :  { %v652_v46 = vmul.f32 %v1662_v33, %v1658_v45  ;;  %v1664_v57 = vpop.eup %1663  ;;  %v124_v39 = vmul.f32 %v2024_v43, %v66_v63  ;;  %v123_v40 = vmul.f32 %v2026_v44, %v66_v63  ;;  %v125_v55 = vmul.f32 %v2037_v52, %v66_v63 }
 0x22c   :  { %v2109_v56 = vadd.f32 %v653_v53, %v652_v46  ;;  %v178_v42 = vadd.f32 %v2032_v49, %v124_v39  ;;  %v177_v41 = vadd.f32 %v2035_v51, %v123_v40 }
 0x22e   :  { %1665 = vtanh.f32 %v2109_v56 }
 0x238   :  { %v1666_v36 = vpop.eup %1665 }
 0x239   :  { %v656_v37 = vmul.f32 %v1666_v36, %v1664_v57  ;;  %v179_v57 = vadd.f32 %v2042_v59, %v125_v55  ;;  %v122_v36 = vmul.f32 %v2044_v60, %v66_v63 }
 0x23b   :  { %v662_v38 = vpack.c.bf16 %v656_v37, %v656_v37 }
 0x23d   :  { %696 = vmatmul.mubr.bf16.vlgmr.msra.gmra.mrb[8].mxu0 %v662_v38  ;;  %737 = vmatmul.mubr.bf16.vlgmr.msra.gmra.mrb[8].mxu1 %v662_v38  ;;  %v176_v38 = vadd.f32 %v2048_v48, %v122_v36 }
 0x23e   :  { %780 = vmatpush1.bf16.msra.mxu0 %v1882_v3  ;;  %821 = vmatpush1.bf16.msra.mxu1 %v1884_v4 }
 0x23f   :  { %781 = vmatprep.subr.bf16.mxu0 %v1887_v5  ;;  %822 = vmatprep.subr.bf16.mxu1 %v1891_v6 }
 0x240   :  { %811 = vmatprep.mubr.bf16.mxu0 %v1822_v0  ;;  %852 = vmatprep.mubr.bf16.mxu1 %v1822_v0 }
 0x242   :  { %782 = vmatpush1.bf16.msra.mxu0 %v1893_v7  ;;  %823 = vmatpush1.bf16.msra.mxu1 %v1896_v8 }
 0x243   :  { %783 = vmatprep.subr.bf16.mxu0 %v1899_v9  ;;  %824 = vmatprep.subr.bf16.mxu1 %v1901_v10 }
 0x246   :  { %784 = vmatpush1.bf16.msra.mxu0 %v1903_v11  ;;  %825 = vmatpush1.bf16.msra.mxu1 %v1905_v12 }
 0x247   :  { %785 = vmatprep.subr.bf16.mxu0 %v1909_v13  ;;  %826 = vmatprep.subr.bf16.mxu1 %v1913_v14 }
 0x24a   :  { %786 = vmatpush1.bf16.msra.mxu0 %v1915_v15  ;;  %827 = vmatpush1.bf16.msra.mxu1 %v1919_v16 }
 0x24b   :  { %787 = vmatprep.subr.bf16.mxu0 %v1921_v17  ;;  %828 = vmatprep.subr.bf16.mxu1 %v1925_v18 }
 0x24e   :  { %788 = vmatpush1.bf16.msra.mxu0 %v1927_v19  ;;  %829 = vmatpush1.bf16.msra.mxu1 %v1929_v20 }
 0x24f   :  { %789 = vmatprep.subr.bf16.mxu0 %v1933_v21  ;;  %830 = vmatprep.subr.bf16.mxu1 %v1937_v22 }
 0x252   :  { %790 = vmatpush1.bf16.msra.mxu0 %v1941_v23  ;;  %831 = vmatpush1.bf16.msra.mxu1 %v1943_v24 }
 0x253   :  { %791 = vmatprep.subr.bf16.mxu0 %v1947_v25  ;;  %832 = vmatprep.subr.bf16.mxu1 %v1949_v26 }
 0x256   :  { %792 = vmatpush1.bf16.msra.mxu0 %v1954_v28  ;;  %833 = vmatpush1.bf16.msra.mxu1 %v1956_v29 }
 0x257   :  { %793 = vmatprep.subr.bf16.mxu0 %v1961_v31  ;;  %834 = vmatprep.subr.bf16.mxu1 %v1963_v32 }
 0x25a   :  { %794 = vmatpush1.bf16.msra.mxu0 %v1974_v34  ;;  %835 = vmatpush1.bf16.msra.mxu1 %v1976_v35 }
 0x25b   :  { %895 = vmatprep.subr.bf16.mxu0 %v1877_v1  ;;  %936 = vmatprep.subr.bf16.mxu1 %v1879_v2 }
 0x310   :  { %v697_v50 = vpop.f32.mrb[8].mxu0  ;;  %v738_v54 = vpop.f32.mrb[8].mxu1 }
 0x311   :  { %v747_v62 = vadd.f32 %v738_v54, %v178_v42  ;;  %v699_v61 = vpop.f32.mrb[9].mxu0  ;;  %v740_v58 = vpop.f32.mrb[9].mxu1  ;;  %v745_v40 = vadd.f32 %v697_v50, %v176_v38 }
 0x312   :  { %v746_v27 = vadd.f32 %v699_v61, %v177_v41  ;;  %v701_v45 = vpop.f32.mrb[10].mxu0  ;;  %v742_v30 = vpop.f32.mrb[10].mxu1  ;;  %v748_v37 = vadd.f32 %v740_v58, %v179_v57 }
 0x313   :  { %v1515_v33 = vmul.f32 -1.442695, %v747_v62  ;;  %v702_v53 = vpop.f32.mrb[11].mxu0  ;;  %v743_v47 = vpop.f32.mrb[11].mxu1 }
 0x314   :  { %v1514_v46 = vmul.f32 -1.442695, %v746_v27  ;;  %v1516_v39 = vmul.f32 -1.442695, %v748_v37 }
 0x315   :  { %1667 = vpow2.f32 %v1515_v33 }
 0x316   :  { %1669 = vpow2.f32 %v1514_v46 }
 0x317   :  { %1671 = vpow2.f32 %v1516_v39 }
 0x318   :  { %1673 = vtanh.f32 %v745_v40 }
 0x31f   :  { %v1668_v42 = vpop.eup %1667 }
 0x320   :  { %v1670_v54 = vpop.eup %1669  ;;  %v760_v41 = vadd.f32 1.0, %v1668_v42 }
 0x321   :  { %v759_v62 = vadd.f32 1.0, %v1670_v54  ;;  %v1672_v61 = vpop.eup %1671 }
 0x322   :  { %1675 = vrcp.f32 %v760_v41  ;;  %v1674_v27 = vpop.eup %1673  ;;  %v761_v30 = vadd.f32 1.0, %v1672_v61 }
 0x323   :  { %1677 = vrcp.f32 %v759_v62 }
 0x324   :  { %1679 = vrcp.f32 %v761_v30 }
 0x32c   :  { %v1676_v55 = vpop.eup %1675 }
 0x32d   :  { %v1678_v45 = vpop.eup %1677  ;;  %v769_v63 = vmul.f32 %v1676_v55, %v2109_v56  ;;  %v71_v56 = vpop.permute.xlu1 %70 }
 0x32e   :  { %v768_v58 = vmul.f32 %v1678_v45, %v1674_v27  ;;  %v1680_v50 = vpop.eup %1679  ;;  %v128_v57 = vmul.f32 %v2024_v43, %v71_v56  ;;  %v127_v36 = vmul.f32 %v2026_v44, %v71_v56  ;;  %v129_v61 = vmul.f32 %v2037_v52, %v71_v56 }
 0x330   :  { %v2155_v33 = vadd.f32 %v769_v63, %v768_v58  ;;  %v182_v37 = vadd.f32 %v2032_v49, %v128_v57  ;;  %v181_v40 = vadd.f32 %v2035_v51, %v127_v36  ;;  %v183_v30 = vadd.f32 %v2042_v59, %v129_v61 }
 0x331   :  { %v126_v58 = vmul.f32 %v2044_v60, %v71_v56 }
 0x332   :  { %1681 = vtanh.f32 %v2155_v33 }
 0x33c   :  { %v1682_v53 = vpop.eup %1681 }
 0x33d   :  { %v772_v47 = vmul.f32 %v1682_v53, %v1680_v50  ;;  %v180_v53 = vadd.f32 %v2048_v48, %v126_v58 }
 0x33f   :  { %v778_v46 = vpack.c.bf16 %v772_v47, %v772_v47 }
 0x341   :  { %812 = vmatmul.mubr.bf16.vlgmr.msra.gmra.mrb[12].mxu0 %v778_v46  ;;  %853 = vmatmul.mubr.bf16.vlgmr.msra.gmra.mrb[12].mxu1 %v778_v46 }
 0x342   :  { %896 = vmatpush1.bf16.msra.mxu0 %v1882_v3  ;;  %937 = vmatpush1.bf16.msra.mxu1 %v1884_v4 }
 0x343   :  { %897 = vmatprep.subr.bf16.mxu0 %v1887_v5  ;;  %938 = vmatprep.subr.bf16.mxu1 %v1891_v6 }
 0x344   :  { %927 = vmatprep.mubr.bf16.mxu0 %v1822_v0  ;;  %968 = vmatprep.mubr.bf16.mxu1 %v1822_v0 }
 0x346   :  { %898 = vmatpush1.bf16.msra.mxu0 %v1893_v7  ;;  %939 = vmatpush1.bf16.msra.mxu1 %v1896_v8 }
 0x347   :  { %899 = vmatprep.subr.bf16.mxu0 %v1899_v9  ;;  %940 = vmatprep.subr.bf16.mxu1 %v1901_v10 }
 0x34a   :  { %900 = vmatpush1.bf16.msra.mxu0 %v1903_v11  ;;  %941 = vmatpush1.bf16.msra.mxu1 %v1905_v12 }
 0x34b   :  { %901 = vmatprep.subr.bf16.mxu0 %v1909_v13  ;;  %942 = vmatprep.subr.bf16.mxu1 %v1913_v14 }
 0x34e   :  { %902 = vmatpush1.bf16.msra.mxu0 %v1915_v15  ;;  %943 = vmatpush1.bf16.msra.mxu1 %v1919_v16 }
 0x34f   :  { %903 = vmatprep.subr.bf16.mxu0 %v1921_v17  ;;  %944 = vmatprep.subr.bf16.mxu1 %v1925_v18 }
 0x352   :  { %904 = vmatpush1.bf16.msra.mxu0 %v1927_v19  ;;  %945 = vmatpush1.bf16.msra.mxu1 %v1929_v20 }
 0x353   :  { %905 = vmatprep.subr.bf16.mxu0 %v1933_v21  ;;  %946 = vmatprep.subr.bf16.mxu1 %v1937_v22 }
 0x356   :  { %906 = vmatpush1.bf16.msra.mxu0 %v1941_v23  ;;  %947 = vmatpush1.bf16.msra.mxu1 %v1943_v24 }
 0x357   :  { %907 = vmatprep.subr.bf16.mxu0 %v1947_v25  ;;  %948 = vmatprep.subr.bf16.mxu1 %v1949_v26 }
 0x35a   :  { %908 = vmatpush1.bf16.msra.mxu0 %v1954_v28  ;;  %949 = vmatpush1.bf16.msra.mxu1 %v1956_v29 }
 0x35b   :  { %909 = vmatprep.subr.bf16.mxu0 %v1961_v31  ;;  %950 = vmatprep.subr.bf16.mxu1 %v1963_v32 }
 0x35e   :  { %910 = vmatpush1.bf16.msra.mxu0 %v1974_v34  ;;  %951 = vmatpush1.bf16.msra.mxu1 %v1976_v35 }
 0x35f   :  { %1011 = vmatprep.subr.bf16.mxu0 %v1877_v1  ;;  %1052 = vmatprep.subr.bf16.mxu1 %v1879_v2 }
 0x414   :  { %v813_v38 = vpop.f32.mrb[12].mxu0  ;;  %v854_v39 = vpop.f32.mrb[12].mxu1 }
 0x415   :  { %v863_v42 = vadd.f32 %v854_v39, %v182_v37  ;;  %v815_v54 = vpop.f32.mrb[13].mxu0  ;;  %v856_v41 = vpop.f32.mrb[13].mxu1  ;;  %v861_v46 = vadd.f32 %v813_v38, %v180_v53 }
 0x416   :  { %v862_v62 = vadd.f32 %v815_v54, %v181_v40  ;;  %v817_v1 = vpop.f32.mrb[14].mxu0  ;;  %v858_v27 = vpop.f32.mrb[14].mxu1  ;;  %v864_v50 = vadd.f32 %v856_v41, %v183_v30 }
 0x417   :  { %v1518_v2 = vmul.f32 -1.442695, %v863_v42  ;;  %v818_v55 = vpop.f32.mrb[15].mxu0  ;;  %v859_v45 = vpop.f32.mrb[15].mxu1 }
 0x418   :  { %v1517_v63 = vmul.f32 -1.442695, %v862_v62  ;;  %v1519_v47 = vmul.f32 -1.442695, %v864_v50 }
 0x419   :  { %1683 = vpow2.f32 %v1518_v2 }
 0x41a   :  { %1685 = vpow2.f32 %v1517_v63 }
 0x41b   :  { %1687 = vpow2.f32 %v1519_v47 }
 0x41c   :  { %1689 = vtanh.f32 %v861_v46 }
 0x423   :  { %v1684_v57 = vpop.eup %1683 }
 0x424   :  { %v1686_v36 = vpop.eup %1685  ;;  %v876_v37 = vadd.f32 1.0, %v1684_v57 }
 0x425   :  { %v875_v39 = vadd.f32 1.0, %v1686_v36  ;;  %v1688_v40 = vpop.eup %1687 }
 0x426   :  { %1691 = vrcp.f32 %v876_v37  ;;  %v1690_v42 = vpop.eup %1689  ;;  %v877_v56 = vadd.f32 1.0, %v1688_v40 }
 0x427   :  { %1693 = vrcp.f32 %v875_v39 }
 0x428   :  { %1695 = vrcp.f32 %v877_v56  ;;  %v2260_v56 = vld [vmem:[#allocation5 + $0x24] ss:$16 sps:$4 sm:$0xff]  }
 0x430   :  { %v1692_v54 = vpop.eup %1691 }
 0x431   :  { %v1694_v62 = vpop.eup %1693  ;;  %v885_v61 = vmul.f32 %v1692_v54, %v2155_v33 }
 0x432   :  { %v884_v41 = vmul.f32 %v1694_v62, %v1690_v42  ;;  %v1696_v38 = vpop.eup %1695  ;;  %v2254_v62 = vld [vmem:[#allocation5] ss:$16 sps:$4 sm:$0xff]  }
 0x434   :  { %v2201_v1 = vadd.f32 %v885_v61, %v884_v41  ;;  %v2257_v61 = vld [vmem:[#allocation5 + $0x8] ss:$16 sps:$4 sm:$0xff]   ;;  %v2263_v41 = vld [vmem:[#allocation5 + $0x2c] ss:$16 sps:$4 sm:$0xff]  }
 0x436   :  { %1697 = vtanh.f32 %v2201_v1 }
 0x440   :  { %v1698_v27 = vpop.eup %1697 }
 0x441   :  { %v888_v2 = vmul.f32 %v1698_v27, %v1696_v38  ;;  %v2271_v38 = vld [vmem:[#allocation5 + $0x28] ss:$16 sps:$4 sm:$0xff]   ;;  %v2274_v27 = vld [vmem:[#allocation5 + $0x44] ss:$16 sps:$4 sm:$0xff]  }
 0x443   :  { %v894_v55 = vpack.c.bf16 %v888_v2, %v888_v2  ;;  %v2277_v2 = vld [vmem:[#allocation5 + $0x4c] ss:$16 sps:$4 sm:$0xff]  }
 0x445   :  { %928 = vmatmul.mubr.bf16.vlgmr.msra.gmra.mrb[16].mxu0 %v894_v55  ;;  %969 = vmatmul.mubr.bf16.vlgmr.msra.gmra.mrb[16].mxu1 %v894_v55  ;;  %v2280_v55 = vld [vmem:[#allocation5 + $0x40] ss:$16 sps:$4 sm:$0xff]  }
 0x446   :  { %1012 = vmatpush1.bf16.msra.mxu0 %v1882_v3  ;;  %1053 = vmatpush1.bf16.msra.mxu1 %v1884_v4  ;;  %v2236_v3 = vld [vmem:[#allocation5 + $0x4] ss:$16 sps:$4 sm:$0xff]   ;;  %v2239_v4 = vld [vmem:[#allocation5 + $0xc] ss:$16 sps:$4 sm:$0xff]  }
 0x447   :  { %1013 = vmatprep.subr.bf16.mxu0 %v1887_v5  ;;  %1054 = vmatprep.subr.bf16.mxu1 %v1891_v6  ;;  %v76_v5 = vpop.permute.xlu0 %75 }
 0x448   :  { %1043 = vmatprep.mubr.bf16.mxu0 %v1822_v0  ;;  %1084 = vmatprep.mubr.bf16.mxu1 %v1822_v0  ;;  %v132_v6 = vmul.f32 %v2024_v43, %v76_v5 }
 0x44a   :  { %1014 = vmatpush1.bf16.msra.mxu0 %v1893_v7  ;;  %1055 = vmatpush1.bf16.msra.mxu1 %v1896_v8  ;;  %v131_v7 = vmul.f32 %v2026_v44, %v76_v5  ;;  %v186_v8 = vadd.f32 %v2032_v49, %v132_v6  ;;  %v2286_v6 = vld [vmem:[#allocation5 + $0x64] ss:$16 sps:$4 sm:$0xff]  }
 0x44b   :  { %1015 = vmatprep.subr.bf16.mxu0 %v1899_v9  ;;  %1056 = vmatprep.subr.bf16.mxu1 %v1901_v10 }
 0x44e   :  { %1016 = vmatpush1.bf16.msra.mxu0 %v1903_v11  ;;  %1057 = vmatpush1.bf16.msra.mxu1 %v1905_v12  ;;  %v185_v11 = vadd.f32 %v2035_v51, %v131_v7  ;;  %v2289_v7 = vld [vmem:[#allocation5 + $0x6c] ss:$16 sps:$4 sm:$0xff]  }
 0x44f   :  { %1017 = vmatprep.subr.bf16.mxu0 %v1909_v13  ;;  %1058 = vmatprep.subr.bf16.mxu1 %v1913_v14 }
 0x452   :  { %1018 = vmatpush1.bf16.msra.mxu0 %v1915_v15  ;;  %1059 = vmatpush1.bf16.msra.mxu1 %v1919_v16  ;;  %v133_v16 = vmul.f32 %v2037_v52, %v76_v5 }
 0x453   :  { %1019 = vmatprep.subr.bf16.mxu0 %v1921_v17  ;;  %1060 = vmatprep.subr.bf16.mxu1 %v1925_v18 }
 0x456   :  { %1020 = vmatpush1.bf16.msra.mxu0 %v1927_v19  ;;  %1061 = vmatpush1.bf16.msra.mxu1 %v1929_v20 }
 0x457   :  { %1021 = vmatprep.subr.bf16.mxu0 %v1933_v21  ;;  %1062 = vmatprep.subr.bf16.mxu1 %v1937_v22 }
 0x45a   :  { %1022 = vmatpush1.bf16.msra.mxu0 %v1941_v23  ;;  %1063 = vmatpush1.bf16.msra.mxu1 %v1943_v24  ;;  %v187_v23 = vadd.f32 %v2042_v59, %v133_v16  ;;  %v130_v24 = vmul.f32 %v2044_v60, %v76_v5  ;;  %v2283_v5 = vld [vmem:[#allocation5 + $0x48] ss:$16 sps:$4 sm:$0xff]   ;;  %v2316_v16 = vld [vmem:[#allocation5 + $0xa0] ss:$16 sps:$4 sm:$0xff]  }
 0x45b   :  { %1023 = vmatprep.subr.bf16.mxu0 %v1947_v25  ;;  %1064 = vmatprep.subr.bf16.mxu1 %v1949_v26 }
 0x45c   :  { %v184_v26 = vadd.f32 %v2048_v48, %v130_v24 }
 0x45e   :  { %1024 = vmatpush1.bf16.msra.mxu0 %v1954_v28  ;;  %1065 = vmatpush1.bf16.msra.mxu1 %v1956_v29 }
 0x45f   :  { %1025 = vmatprep.subr.bf16.mxu0 %v1961_v31  ;;  %1066 = vmatprep.subr.bf16.mxu1 %v1963_v32 }
 0x462   :  { %1026 = vmatpush1.bf16.msra.mxu0 %v1974_v34  ;;  %1067 = vmatpush1.bf16.msra.mxu1 %v1976_v35 }
 0x463   :  { %1127 = vmatprep.subr.bf16.mxu0 %v2236_v3  ;;  %1168 = vmatprep.subr.bf16.mxu1 %v2239_v4 }
 0x518   :  { %v929_v9 = vpop.f32.mrb[16].mxu0  ;;  %v970_v10 = vpop.f32.mrb[16].mxu1 }
 0x519   :  { %v979_v12 = vadd.f32 %v970_v10, %v186_v8  ;;  %v931_v13 = vpop.f32.mrb[17].mxu0  ;;  %v972_v14 = vpop.f32.mrb[17].mxu1  ;;  %v977_v29 = vadd.f32 %v929_v9, %v184_v26  ;;  %v2292_v8 = vld [vmem:[#allocation5 + $0x60] ss:$16 sps:$4 sm:$0xff]   ;;  %v2295_v9 = vld [vmem:[#allocation5 + $0x68] ss:$16 sps:$4 sm:$0xff]  }
 0x51a   :  { %v978_v15 = vadd.f32 %v931_v13, %v185_v11  ;;  %v933_v17 = vpop.f32.mrb[18].mxu0  ;;  %v974_v18 = vpop.f32.mrb[18].mxu1  ;;  %v980_v25 = vadd.f32 %v972_v14, %v187_v23  ;;  %v2298_v10 = vld [vmem:[#allocation5 + $0x84] ss:$16 sps:$4 sm:$0xff]   ;;  %v2301_v11 = vld [vmem:[#allocation5 + $0x8c] ss:$16 sps:$4 sm:$0xff]  }
 0x51b   :  { %v1521_v19 = vmul.f32 -1.442695, %v979_v12  ;;  %v934_v20 = vpop.f32.mrb[19].mxu0  ;;  %v975_v21 = vpop.f32.mrb[19].mxu1  ;;  %v2304_v12 = vld [vmem:[#allocation5 + $0x80] ss:$16 sps:$4 sm:$0xff]  }
 0x51c   :  { %v1520_v22 = vmul.f32 -1.442695, %v978_v15  ;;  %v1522_v28 = vmul.f32 -1.442695, %v980_v25  ;;  %v2307_v13 = vld [vmem:[#allocation5 + $0x88] ss:$16 sps:$4 sm:$0xff]  }
 0x51d   :  { %1699 = vpow2.f32 %v1521_v19  ;;  %v2310_v14 = vld [vmem:[#allocation5 + $0xa4] ss:$16 sps:$4 sm:$0xff]   ;;  %v2313_v15 = vld [vmem:[#allocation5 + $0xac] ss:$16 sps:$4 sm:$0xff]   ;;  %v2319_v17 = vld [vmem:[#allocation5 + $0xa8] ss:$16 sps:$4 sm:$0xff]  }
 0x51e   :  { %1701 = vpow2.f32 %v1520_v22  ;;  %v2322_v18 = vld [vmem:[#allocation5 + $0xc4] ss:$16 sps:$4 sm:$0xff]   ;;  %v2325_v19 = vld [vmem:[#allocation5 + $0xcc] ss:$16 sps:$4 sm:$0xff]   ;;  %v2328_v20 = vld [vmem:[#allocation5 + $0xc0] ss:$16 sps:$4 sm:$0xff]   ;;  %v81_v22 = vpop.permute.xlu1 %80 }
 0x51f   :  { %1703 = vpow2.f32 %v1522_v28  ;;  %v2331_v21 = vld [vmem:[#allocation5 + $0xc8] ss:$16 sps:$4 sm:$0xff]   ;;  %v136_v23 = vmul.f32 %v2024_v43, %v81_v22  ;;  %v135_v24 = vmul.f32 %v2026_v44, %v81_v22 }
 0x520   :  { %1705 = vtanh.f32 %v977_v29 }
 0x521   :  { %v190_v25 = vadd.f32 %v2032_v49, %v136_v23 }
 0x527   :  { %v1700_v33 = vpop.eup %1699 }
 0x528   :  { %v1702_v45 = vpop.eup %1701  ;;  %v992_v63 = vadd.f32 1.0, %v1700_v33 }
 0x529   :  { %v991_v30 = vadd.f32 1.0, %v1702_v45  ;;  %v1704_v58 = vpop.eup %1703 }
 0x52a   :  { %1707 = vrcp.f32 %v992_v63  ;;  %v1706_v50 = vpop.eup %1705  ;;  %v993_v57 = vadd.f32 1.0, %v1704_v58 }
 0x52b   :  { %1709 = vrcp.f32 %v991_v30 }
 0x52c   :  { %1711 = vrcp.f32 %v993_v57 }
 0x534   :  { %v1708_v53 = vpop.eup %1707 }
 0x535   :  { %v1710_v47 = vpop.eup %1709  ;;  %v1001_v46 = vmul.f32 %v1708_v53, %v2201_v1  ;;  %v2268_v1 = vld [vmem:[#allocation5 + $0x20] ss:$16 sps:$4 sm:$0xff]   ;;  %v134_v53 = vmul.f32 %v2044_v60, %v81_v22 }
 0x536   :  { %v1000_v36 = vmul.f32 %v1710_v47, %v1706_v50  ;;  %v1712_v39 = vpop.eup %1711 }
 0x538   :  { %v2251_v37 = vadd.f32 %v1001_v46, %v1000_v36  ;;  %v188_v46 = vadd.f32 %v2048_v48, %v134_v53 }
 0x53a   :  { %1713 = vtanh.f32 %v2251_v37 }
 0x544   :  { %v1714_v40 = vpop.eup %1713 }
 0x545   :  { %v1004_v42 = vmul.f32 %v1714_v40, %v1712_v39 }
 0x547   :  { %v1010_v54 = vpack.c.bf16 %v1004_v42, %v1004_v42 }
 0x549   :  { %1044 = vmatmul.mubr.bf16.vlgmr.msra.gmra.mrb[20].mxu0 %v1010_v54  ;;  %1085 = vmatmul.mubr.bf16.vlgmr.msra.gmra.mrb[20].mxu1 %v1010_v54 }
 0x54a   :  { %1128 = vmatpush1.bf16.msra.mxu0 %v2254_v62  ;;  %1169 = vmatpush1.bf16.msra.mxu1 %v2257_v61 }
 0x54b   :  { %1129 = vmatprep.subr.bf16.mxu0 %v2260_v56  ;;  %1170 = vmatprep.subr.bf16.mxu1 %v2263_v41 }
 0x54c   :  { %1159 = vmatprep.mubr.bf16.mxu0 %v1822_v0  ;;  %1200 = vmatprep.mubr.bf16.mxu1 %v1822_v0 }
 0x54e   :  { %1130 = vmatpush1.bf16.msra.mxu0 %v2268_v1  ;;  %1171 = vmatpush1.bf16.msra.mxu1 %v2271_v38 }
 0x54f   :  { %1131 = vmatprep.subr.bf16.mxu0 %v2274_v27  ;;  %1172 = vmatprep.subr.bf16.mxu1 %v2277_v2 }
 0x552   :  { %1132 = vmatpush1.bf16.msra.mxu0 %v2280_v55  ;;  %1173 = vmatpush1.bf16.msra.mxu1 %v2283_v5 }
 0x553   :  { %1133 = vmatprep.subr.bf16.mxu0 %v2286_v6  ;;  %1174 = vmatprep.subr.bf16.mxu1 %v2289_v7 }
 0x556   :  { %1134 = vmatpush1.bf16.msra.mxu0 %v2292_v8  ;;  %1175 = vmatpush1.bf16.msra.mxu1 %v2295_v9 }
 0x557   :  { %1135 = vmatprep.subr.bf16.mxu0 %v2298_v10  ;;  %1176 = vmatprep.subr.bf16.mxu1 %v2301_v11 }
 0x55a   :  { %1136 = vmatpush1.bf16.msra.mxu0 %v2304_v12  ;;  %1177 = vmatpush1.bf16.msra.mxu1 %v2307_v13 }
 0x55b   :  { %1137 = vmatprep.subr.bf16.mxu0 %v2310_v14  ;;  %1178 = vmatprep.subr.bf16.mxu1 %v2313_v15 }
 0x55e   :  { %1138 = vmatpush1.bf16.msra.mxu0 %v2316_v16  ;;  %1179 = vmatpush1.bf16.msra.mxu1 %v2319_v17 }
 0x55f   :  { %1139 = vmatprep.subr.bf16.mxu0 %v2322_v18  ;;  %1180 = vmatprep.subr.bf16.mxu1 %v2325_v19 }
 0x562   :  { %1140 = vmatpush1.bf16.msra.mxu0 %v2328_v20  ;;  %1181 = vmatpush1.bf16.msra.mxu1 %v2331_v21 }
 0x563   :  { %1141 = vmatprep.subr.bf16.mxu0 %v1961_v31  ;;  %1182 = vmatprep.subr.bf16.mxu1 %v1963_v32  ;;  %v189_v31 = vadd.f32 %v2035_v51, %v135_v24 }
 0x566   :  { %1142 = vmatpush1.bf16.msra.mxu0 %v1974_v34  ;;  %1183 = vmatpush1.bf16.msra.mxu1 %v1976_v35  ;;  %v137_v35 = vmul.f32 %v2037_v52, %v81_v22 }
 0x567   :  { %1243 = vmatprep.subr.bf16.mxu0 %v2236_v3  ;;  %1284 = vmatprep.subr.bf16.mxu1 %v2239_v4 }
 0x568   :  { %v191_v50 = vadd.f32 %v2042_v59, %v137_v35 }
 0x61c   :  { %v1045_v26 = vpop.f32.mrb[20].mxu0  ;;  %v1086_v28 = vpop.f32.mrb[20].mxu1 }
 0x61d   :  { %v1095_v32 = vadd.f32 %v1086_v28, %v190_v25  ;;  %v1047_v29 = vpop.f32.mrb[21].mxu0  ;;  %v1088_v34 = vpop.f32.mrb[21].mxu1  ;;  %v1093_v36 = vadd.f32 %v1045_v26, %v188_v46 }
 0x61e   :  { %v1094_v33 = vadd.f32 %v1047_v29, %v189_v31  ;;  %v1049_v3 = vpop.f32.mrb[22].mxu0  ;;  %v1090_v45 = vpop.f32.mrb[22].mxu1  ;;  %v1096_v47 = vadd.f32 %v1088_v34, %v191_v50 }
 0x61f   :  { %v1524_v4 = vmul.f32 -1.442695, %v1095_v32  ;;  %v1050_v63 = vpop.f32.mrb[23].mxu0  ;;  %v1091_v30 = vpop.f32.mrb[23].mxu1 }
 0x620   :  { %v1523_v58 = vmul.f32 -1.442695, %v1094_v33  ;;  %v1525_v57 = vmul.f32 -1.442695, %v1096_v47 }
 0x621   :  { %1715 = vpow2.f32 %v1524_v4 }
 0x622   :  { %1717 = vpow2.f32 %v1523_v58 }
 0x623   :  { %1719 = vpow2.f32 %v1525_v57 }
 0x624   :  { %1721 = vtanh.f32 %v1093_v36 }
 0x62b   :  { %v1716_v39 = vpop.eup %1715 }
 0x62c   :  { %v1718_v40 = vpop.eup %1717  ;;  %v1108_v42 = vadd.f32 1.0, %v1716_v39 }
 0x62d   :  { %v1107_v54 = vadd.f32 1.0, %v1718_v40  ;;  %v1720_v23 = vpop.eup %1719 }
 0x62e   :  { %1723 = vrcp.f32 %v1108_v42  ;;  %v1722_v24 = vpop.eup %1721  ;;  %v1109_v22 = vadd.f32 1.0, %v1720_v23  ;;  %v1627_v23 = vld [vmem:[%s2435_s4] sm:$0xff]  }
 0x62f   :  { %1725 = vrcp.f32 %v1107_v54 }
 0x630   :  { %1727 = vrcp.f32 %v1109_v22  ;;  %v1631_v22 = vld [vmem:[%s2435_s4 + $0x20] sm:$0xff]  }
 0x638   :  { %v1724_v25 = vpop.eup %1723 }
 0x639   :  { %v1726_v28 = vpop.eup %1725  ;;  %v1117_v31 = vmul.f32 %v1724_v25, %v2251_v37  ;;  %v1792_v37 = vld [vmem:[#allocation5 + $0xec] ss:$16 sps:$4 sm:$0xff]  }
 0x63a   :  { %v1116_v32 = vmul.f32 %v1726_v28, %v1722_v24  ;;  %v1728_v26 = vpop.eup %1727  ;;  %v1824_v24 = vmov 0.0   ;;  %v1628_v25 = vld [vmem:[%s2435_s4 + $0x8] sm:$0xff]   ;;  %v1629_v28 = vld [vmem:[%s2435_s4 + $0x10] sm:$0xff]  }
 0x63c   :  { %v2349_v29 = vadd.f32 %v1117_v31, %v1116_v32  ;;  %v1630_v31 = vld [vmem:[%s2435_s4 + $0x18] sm:$0xff]   ;;  %v1632_v32 = vld [vmem:[%s2435_s4 + $0x28] sm:$0xff]  }
 0x63e   :  { %1729 = vtanh.f32 %v2349_v29 }
 0x648   :  { %v1730_v34 = vpop.eup %1729 }
 0x649   :  { %v1120_v33 = vmul.f32 %v1730_v34, %v1728_v26  ;;  %v1634_v26 = vld [vmem:[%s2435_s4 + $0x38] sm:$0xff]   ;;  %v91_v34 = vpop.permute.xlu1 %90 }
 0x64b   :  { %v1126_v35 = vpack.c.bf16 %v1120_v33, %v1120_v33  ;;  %v144_v33 = vmul.f32 %v2024_v43, %v91_v34 }
 0x64d   :  { %1160 = vmatmul.mubr.bf16.vlgmr.msra.gmra.mrb[24].mxu0 %v1126_v35  ;;  %1201 = vmatmul.mubr.bf16.vlgmr.msra.gmra.mrb[24].mxu1 %v1126_v35  ;;  %v143_v35 = vmul.f32 %v2026_v44, %v91_v34 }
 0x64e   :  { %1244 = vmatpush1.bf16.msra.mxu0 %v2254_v62  ;;  %1285 = vmatpush1.bf16.msra.mxu1 %v2257_v61  ;;  %v1793_v62 = vld [vmem:[#allocation5 + $0xe0] ss:$16 sps:$4 sm:$0xff]   ;;  %v1794_v61 = vld [vmem:[#allocation5 + $0xe8] ss:$16 sps:$4 sm:$0xff]  }
 0x64f   :  { %1245 = vmatprep.subr.bf16.mxu0 %v2260_v56  ;;  %1286 = vmatprep.subr.bf16.mxu1 %v2263_v41  ;;  %v86_v56 = vpop.permute.xlu0 %85 }
 0x650   :  { %1275 = vmatprep.mubr.bf16.mxu0 %v1822_v0  ;;  %1316 = vmatprep.mubr.bf16.mxu1 %v1822_v0  ;;  %v1791_v0 = vld [vmem:[#allocation5 + $0xe4] ss:$16 sps:$4 sm:$0xff]   ;;  %v140_v41 = vmul.f32 %v2024_v43, %v86_v56 }
 0x652   :  { %1246 = vmatpush1.bf16.msra.mxu0 %v2268_v1  ;;  %1287 = vmatpush1.bf16.msra.mxu1 %v2271_v38  ;;  %v139_v1 = vmul.f32 %v2026_v44, %v86_v56  ;;  %v194_v38 = vadd.f32 %v2032_v49, %v140_v41 }
 0x653   :  { %1247 = vmatprep.subr.bf16.mxu0 %v2274_v27  ;;  %1288 = vmatprep.subr.bf16.mxu1 %v2277_v2 }
 0x656   :  { %1248 = vmatpush1.bf16.msra.mxu0 %v2280_v55  ;;  %1289 = vmatpush1.bf16.msra.mxu1 %v2283_v5  ;;  %v193_v55 = vadd.f32 %v2035_v51, %v139_v1 }
 0x657   :  { %1249 = vmatprep.subr.bf16.mxu0 %v2286_v6  ;;  %1290 = vmatprep.subr.bf16.mxu1 %v2289_v7 }
 0x65a   :  { %1250 = vmatpush1.bf16.msra.mxu0 %v2292_v8  ;;  %1291 = vmatpush1.bf16.msra.mxu1 %v2295_v9  ;;  %v141_v8 = vmul.f32 %v2037_v52, %v86_v56 }
 0x65b   :  { %1251 = vmatprep.subr.bf16.mxu0 %v2298_v10  ;;  %1292 = vmatprep.subr.bf16.mxu1 %v2301_v11 }
 0x65e   :  { %1252 = vmatpush1.bf16.msra.mxu0 %v2304_v12  ;;  %1293 = vmatpush1.bf16.msra.mxu1 %v2307_v13 }
 0x65f   :  { %1253 = vmatprep.subr.bf16.mxu0 %v2310_v14  ;;  %1294 = vmatprep.subr.bf16.mxu1 %v2313_v15 }
 0x662   :  { %1254 = vmatpush1.bf16.msra.mxu0 %v2316_v16  ;;  %1295 = vmatpush1.bf16.msra.mxu1 %v2319_v17  ;;  %v195_v16 = vadd.f32 %v2042_v59, %v141_v8  ;;  %v138_v17 = vmul.f32 %v2044_v60, %v86_v56 }
 0x663   :  { %1255 = vmatprep.subr.bf16.mxu0 %v2322_v18  ;;  %1296 = vmatprep.subr.bf16.mxu1 %v2325_v19 }
 0x664   :  { %v192_v19 = vadd.f32 %v2048_v48, %v138_v17 }
 0x666   :  { %1256 = vmatpush1.bf16.msra.mxu0 %v2328_v20  ;;  %1297 = vmatpush1.bf16.msra.mxu1 %v2331_v21 }
 0x667   :  { %1257 = vmatprep.subr.bf16.mxu0 %v1791_v0  ;;  %1298 = vmatprep.subr.bf16.mxu1 %v1792_v37  ;;  %v198_v0 = vadd.f32 %v2032_v49, %v144_v33  ;;  %v142_v49 = vmul.f32 %v2044_v60, %v91_v34 }
 0x66a   :  { %1258 = vmatpush1.bf16.msra.mxu0 %v1793_v62  ;;  %1299 = vmatpush1.bf16.msra.mxu1 %v1794_v61  ;;  %v197_v61 = vadd.f32 %v2035_v51, %v143_v35  ;;  %v196_v51 = vadd.f32 %v2048_v48, %v142_v49 }
 0x66b   :  { %1550 = vmatprep.subr.bf16.mxu0 %v1824_v24 }
 0x720   :  { %v1161_v27 = vpop.f32.mrb[24].mxu0  ;;  %v1202_v2 = vpop.f32.mrb[24].mxu1 }
 0x721   :  { %v1211_v5 = vadd.f32 %v1202_v2, %v194_v38  ;;  %v1163_v6 = vpop.f32.mrb[25].mxu0  ;;  %v1204_v7 = vpop.f32.mrb[25].mxu1  ;;  %v1209_v21 = vadd.f32 %v1161_v27, %v192_v19  ;;  %v145_v38 = vmul.f32 %v2037_v52, %v91_v34 }
 0x722   :  { %v1210_v9 = vadd.f32 %v1163_v6, %v193_v55  ;;  %v1165_v10 = vpop.f32.mrb[26].mxu0  ;;  %v1206_v11 = vpop.f32.mrb[26].mxu1  ;;  %v1212_v18 = vadd.f32 %v1204_v7, %v195_v16 }
 0x723   :  { %v1527_v12 = vmul.f32 -1.442695, %v1211_v5  ;;  %v1166_v13 = vpop.f32.mrb[27].mxu0  ;;  %v1207_v14 = vpop.f32.mrb[27].mxu1  ;;  %v199_v44 = vadd.f32 %v2042_v59, %v145_v38 }
 0x724   :  { %v1526_v15 = vmul.f32 -1.442695, %v1210_v9  ;;  %v1528_v20 = vmul.f32 -1.442695, %v1212_v18 }
 0x725   :  { %1731 = vpow2.f32 %v1527_v12 }
 0x726   :  { %1733 = vpow2.f32 %v1526_v15 }
 0x727   :  { %1735 = vpow2.f32 %v1528_v20 }
 0x728   :  { %1737 = vtanh.f32 %v1209_v21 }
 0x72f   :  { %v1732_v3 = vpop.eup %1731 }
 0x730   :  { %v1734_v45 = vpop.eup %1733  ;;  %v1224_v4 = vadd.f32 1.0, %v1732_v3 }
 0x731   :  { %v1223_v63 = vadd.f32 1.0, %v1734_v45  ;;  %v1736_v30 = vpop.eup %1735  ;;  %v1532_v45 = vld [vmem:[%s2436_s5] ss:$0 sm:$0xff] }
 0x732   :  { %1739 = vrcp.f32 %v1224_v4  ;;  %v1738_v58 = vpop.eup %1737  ;;  %v1225_v46 = vadd.f32 1.0, %v1736_v30 }
 0x733   :  { %1741 = vrcp.f32 %v1223_v63 }
 0x734   :  { %1743 = vrcp.f32 %v1225_v46 }
 0x73c   :  { %v1740_v50 = vpop.eup %1739 }
 0x73d   :  { %v1742_v53 = vpop.eup %1741  ;;  %v1233_v47 = vmul.f32 %v1740_v50, %v2349_v29  ;;  %v1633_v29 = vld [vmem:[%s2435_s4 + $0x30] sm:$0xff]  }
 0x73e   :  { %v1232_v57 = vmul.f32 %v1742_v53, %v1738_v58  ;;  %v1744_v39 = vpop.eup %1743 }
 0x740   :  { %v2389_v36 = vadd.f32 %v1233_v47, %v1232_v57 }
 0x742   :  { %1745 = vtanh.f32 %v2389_v36 }
 0x74c   :  { %v1746_v40 = vpop.eup %1745 }
 0x74d   :  { %v1236_v42 = vmul.f32 %v1746_v40, %v1744_v39 }
 0x74f   :  { %v1242_v54 = vpack.c.bf16 %v1236_v42, %v1236_v42 }
 0x751   :  { %1276 = vmatmul.mubr.bf16.vlgmr.msra.gmra.mrb[28].mxu0 %v1242_v54  ;;  %1317 = vmatmul.mubr.bf16.vlgmr.msra.gmra.mrb[28].mxu1 %v1242_v54 }
 0x752   :  { %1551 = vmatpush3.bf16.msra.mxu0 %v1627_v23  ;;  %1566 = vmatprep.mubr.msk.bf16.mxu0 %vm1825_vm0, %v1824_v24 }
 0x753   :  { %1552 = vmatprep.subr.bf16.mxu0 %v1824_v24 }
 0x756   :  { %1553 = vmatpush3.bf16.msra.mxu0 %v1628_v25 }
 0x757   :  { %1554 = vmatprep.subr.bf16.mxu0 %v1824_v24 }
 0x75a   :  { %1555 = vmatpush3.bf16.msra.mxu0 %v1629_v28 }
 0x75b   :  { %1556 = vmatprep.subr.bf16.mxu0 %v1824_v24 }
 0x75e   :  { %1557 = vmatpush3.bf16.msra.mxu0 %v1630_v31 }
 0x75f   :  { %1558 = vmatprep.subr.bf16.mxu0 %v1824_v24 }
 0x762   :  { %1559 = vmatpush3.bf16.msra.mxu0 %v1631_v22 }
 0x763   :  { %1560 = vmatprep.subr.bf16.mxu0 %v1824_v24 }
 0x766   :  { %1561 = vmatpush3.bf16.msra.mxu0 %v1632_v32 }
 0x767   :  { %1562 = vmatprep.subr.bf16.mxu0 %v1824_v24 }
 0x76a   :  { %1563 = vmatpush3.bf16.msra.mxu0 %v1633_v29 }
 0x76b   :  { %1564 = vmatprep.subr.bf16.mxu0 %v1824_v24 }
 0x76e   :  { %1565 = vmatpush3.bf16.msra.mxu0 %v1634_v26 }
 0x824   :  { %v1277_v37 = vpop.f32.mrb[28].mxu0  ;;  %v1318_v62 = vpop.f32.mrb[28].mxu1 }
 0x825   :  { %v1327_v56 = vadd.f32 %v1318_v62, %v198_v0  ;;  %v1279_v41 = vpop.f32.mrb[29].mxu0  ;;  %v1320_v1 = vpop.f32.mrb[29].mxu1  ;;  %v1325_v10 = vadd.f32 %v1277_v37, %v196_v51 }
 0x826   :  { %v1326_v27 = vadd.f32 %v1279_v41, %v197_v61  ;;  %v1281_v2 = vpop.f32.mrb[30].mxu0  ;;  %v1322_v55 = vpop.f32.mrb[30].mxu1  ;;  %v1328_v8 = vadd.f32 %v1320_v1, %v199_v44 }
 0x827   :  { %v1530_v5 = vmul.f32 -1.442695, %v1327_v56  ;;  %v1282_v6 = vpop.f32.mrb[31].mxu0  ;;  %v1323_v7 = vpop.f32.mrb[31].mxu1 }
 0x828   :  { %v1529_v43 = vmul.f32 -1.442695, %v1326_v27  ;;  %v1531_v9 = vmul.f32 -1.442695, %v1328_v8 }
 0x829   :  { %1747 = vpow2.f32 %v1530_v5 }
 0x82a   :  { %1749 = vpow2.f32 %v1529_v43 }
 0x82b   :  { %1751 = vpow2.f32 %v1531_v9 }
 0x82c   :  { %1753 = vtanh.f32 %v1325_v10 }
 0x833   :  { %v1748_v11 = vpop.eup %1747 }
 0x834   :  { %v1750_v52 = vpop.eup %1749  ;;  %v1340_v12 = vadd.f32 1.0, %v1748_v11 }
 0x835   :  { %v1339_v13 = vadd.f32 1.0, %v1750_v52  ;;  %v1752_v14 = vpop.eup %1751 }
 0x836   :  { %1755 = vrcp.f32 %v1340_v12  ;;  %v1754_v15 = vpop.eup %1753  ;;  %v1341_v60 = vadd.f32 1.0, %v1752_v14 }
 0x837   :  { %1757 = vrcp.f32 %v1339_v13 }
 0x838   :  { %1759 = vrcp.f32 %v1341_v60 }
 0x840   :  { %v1756_v16 = vpop.eup %1755 }
 0x841   :  { %v1758_v17 = vpop.eup %1757  ;;  %v1349_v59 = vmul.f32 %v1756_v16, %v2389_v36 }
 0x842   :  { %v1348_v18 = vmul.f32 %v1758_v17, %v1754_v15  ;;  %v1760_v48 = vpop.eup %1759 }
 0x844   :  { %v1350_v19 = vadd.f32 %v1349_v59, %v1348_v18 }
 0x846   :  { %1761 = vtanh.f32 %v1350_v19 }
 0x850   :  { %v1762_v20 = vpop.eup %1761 }
 0x851   :  { %v1352_v21 = vmul.f32 %v1762_v20, %v1760_v48 }
 0x853   :  { %v1358_v3 = vpack.c.bf16 %v1352_v21, %v1352_v21 }
 0x855   :  { %1567 = vmatmul.mubr.bf16.vlgmr.msra.gmra.mrb[32].mxu0 %v1358_v3 }
 0x928   :  { %v1464_v4 = vpop.f32.mrb[32].mxu0 }
 0x929   :  { %v1465_v63 = vadd.f32 %v1532_v45, %v1464_v4  ;;  %v1568_v30 = vpop.f32.mrb[33].mxu0 }
 0x92a   :  { %v1467_v58 = vpop.f32.mrb[34].mxu0 }
 0x92b   :  { %1470 = vst [vmem:[%s2437_s6] sm:$0xff] %v1465_v63  ;;  %v1569_v50 = vpop.f32.mrb[35].mxu0 }
 0x92c   :  { %1475 = vsyncpa [#allocation6], 1 }

</bundles_post_ra>
